<compile_context>
chip_gen: v5e
topology: v5e:2x2
jax: 0.10.0
libtpu: 0.0.40
codegen_flags: <defaults>
</compile_context>

<pallas_src>
import math
from functools import partial

import jax
import jax.numpy as jnp
from jax import lax
from jax.experimental import pallas as pl
from jax.experimental.pallas import tpu as pltpu

LEAKY_SLOPE = 0.01  # PyTorch nn.LeakyReLU default negative_slope


def _leaky(x):
    return jnp.where(x >= 0, x, LEAKY_SLOPE * x)


# ---------------------------------------------------------------------------
# Per-generation VMEM budgets
# ---------------------------------------------------------------------------
def _device_caps():
    """(per-step tile budget, vmem_limit cap) in bytes for this TPU generation."""
    vmem_bytes = 64 * 2**20
    try:
        info = pltpu.get_tpu_info()
        vmem_bytes = int(getattr(info, "vmem_capacity_bytes", vmem_bytes))
    except Exception:
        pass
    if vmem_bytes >= 100 * 2**20:          # v5e / v6e: 128 MiB physical VMEM
        return 20 * 2**20, 96 * 2**20
    return 10 * 2**20, 48 * 2**20          # v7x: 64 MiB physical VMEM


def _mosaic_params(est_bytes, vmem_cap):
    # Always pass an explicit limit (v5e's default scoped VMEM is only 16 MiB),
    # capped per generation so we keep headroom for double buffers on v7x.
    limit = int(min(vmem_cap, max(4 * est_bytes, 32 * 2**20)))
    return pltpu.CompilerParams(
        dimension_semantics=("parallel", "parallel"),
        vmem_limit_bytes=limit,
    )


# ---------------------------------------------------------------------------
# Tiling helpers
# ---------------------------------------------------------------------------
_L_TILE_CANDIDATES = (8192, 4096, 2048, 1024, 512, 256, 128)


def _halo_block_width(halo):
    w = 128
    while w < halo:
        w *= 2
    return w


def _pick_l_tile(l_total, bytes_per_col, budget, halo_w, max_l_tile=None):
    """Largest lane-aligned (power-of-two * 128) tile that divides l_total, is
    >= halo_w and fits the per-step VMEM budget.  Returns (l_tile, use_halo)."""
    if l_total % 128 == 0:
        cap = max(128, (budget // max(bytes_per_col, 1)) // 128 * 128)
        if max_l_tile is not None:
            cap = min(cap, max_l_tile)
        for cand in _L_TILE_CANDIDATES:
            if (cand <= cap and cand >= halo_w and cand <= l_total
                    and l_total % cand == 0):
                return cand, cand < l_total
    # TODO(synk): non-128-aligned lengths fall back to a single full-length tile;
    # pad/split in the wrapper instead if such an L ever exceeds the VMEM budget.
    return l_total, False


def _halo_specs(src, channels, l_tile, halo_w, use_halo, l_total):
    """Left/right halo inputs: either clamped blocks of the real activation or a
    tiny all-zero source (single-tile fallback; values are masked anyway)."""
    if use_halo:
        bpt = l_tile // halo_w              # halo blocks per tile
        n_hb = l_total // halo_w            # halo blocks along the length axis
        lspec = pl.BlockSpec((1, channels, halo_w),
                             lambda b, j: (b, 0, jnp.maximum(j * bpt - 1, 0)))
        rspec = pl.BlockSpec((1, channels, halo_w),
                             lambda b, j: (b, 0, jnp.minimum((j + 1) * bpt, n_hb - 1)))
        return src, lspec, rspec
    zsrc = jnp.zeros((1, channels, halo_w), src.dtype)
    zspec = pl.BlockSpec((1, channels, halo_w), lambda b, j: (0, 0, 0))
    return zsrc, zspec, zspec


# ---------------------------------------------------------------------------
# Pallas kernels
# ---------------------------------------------------------------------------
def _upconv_kernel(xc_ref, xl_ref, xr_ref, w_ref, b_ref, o_ref, *,
                   ksize, l_tile, halo, halo_w):
    """Fused LeakyReLU + polyphase (stride-upsampling) K-tap 'same' conv, one tile.
    xc: (1, C_in, l_tile); xl/xr: (1, C_in, halo_w); w: (K, s*C_out, C_in) bf16;
    b: (s*C_out, 1) f32; o: (1, s*C_out, l_tile)."""
    j = pl.program_id(1)
    nt = pl.num_programs(1)
    lmask = (j > 0).astype(xl_ref.dtype)
    rmask = (j + 1 < nt).astype(xr_ref.dtype)
    left = xl_ref[0][:, halo_w - halo:] * lmask          # zero at the left edge
    right = xr_ref[0][:, :halo] * rmask                  # zero at the right edge
    xa = _leaky(jnp.concatenate([left, xc_ref[0], right], axis=1))
    acc = jnp.zeros((o_ref.shape[1], l_tile), jnp.float32)
    for k in range(ksize):                               # K accumulating MXU dots
        acc = acc + jnp.dot(w_ref[k], xa[:, k:k + l_tile],
                            preferred_element_type=jnp.float32)
    acc = acc + b_ref[...]
    o_ref[0] = acc.astype(o_ref.dtype)


def _res_stack_kernel(xc_ref, xl_ref, xr_ref, w1_ref, b1_ref, w2_ref, b2_ref, o_ref, *,
                      dilations, l_tile, total_halo, halo_w, compute_dtype):
    """Whole stack of _ResidualDilatedUnit's fused on one tile:
         repeat_i:  x <- x + Conv1x1(leaky(Conv7_{d_i}(leaky(x))))
    The VMEM window shrinks by 6*d_i per unit; positions outside the true signal
    are re-zeroed after every unit so each conv sees its own 'same' zero padding."""
    j = pl.program_id(1)
    nt = pl.num_programs(1)
    lmask = (j > 0).astype(xl_ref.dtype)
    rmask = (j + 1 < nt).astype(xr_ref.dtype)
    left = xl_ref[0][:, halo_w - total_halo:] * lmask
    right = xr_ref[0][:, :total_halo] * rmask
    cur = jnp.concatenate([left, xc_ref[0], right], axis=1).astype(jnp.float32)

    rem = total_halo
    for i, d in enumerate(dilations):
        wn = cur.shape[1] - 6 * d
        rem -= 3 * d
        xa = _leaky(cur).astype(compute_dtype)           # bf16 MXU operands
        acc = jnp.zeros((cur.shape[0], wn), jnp.float32)
        for k in range(7):                               # per-tap accumulating dots
            acc = acc + jnp.dot(w1_ref[i, k], xa[:, k * d:k * d + wn],
                                preferred_element_type=jnp.float32)
        acc = acc + b1_ref[i]
        r = _leaky(acc).astype(compute_dtype)
        r = jnp.dot(w2_ref[i], r, preferred_element_type=jnp.float32) + b2_ref[i]
        cur = cur[:, 3 * d:3 * d + wn] + r               # residual add in f32
        # Zero out-of-signal positions (only bites on the first / last tile).
        col = lax.broadcasted_iota(jnp.int32, (1, wn), 1)
        g = j * l_tile - rem + col
        cur = jnp.where((g >= 0) & (g < nt * l_tile), cur, 0.0)

    o_ref[0] = cur.astype(o_ref.dtype)


# ---------------------------------------------------------------------------
# pallas_call wrappers
# ---------------------------------------------------------------------------
def upsample_conv_pallas(x, w_taps, bias, *, compute_dtype=jnp.bfloat16, max_l_tile=None):
    """leaky -> polyphase K=3 'same' conv.  x: (B, C_in, L), w_taps: (3, s*C_out, C_in),
    bias: (s*C_out,).  Returns phase-major y: (B, s*C_out, L)."""
    B, c_in, L = x.shape
    ksize, co_s, _ = w_taps.shape
    tile_budget, vmem_cap = _device_caps()
    halo = (ksize - 1) // 2
    halo_w = _halo_block_width(halo)

    x = x.astype(compute_dtype)
    w_taps = w_taps.astype(compute_dtype)
    bias = bias.astype(jnp.float32).reshape(co_s, 1)

    it = jnp.dtype(compute_dtype).itemsize
    weight_bytes = w_taps.size * it + bias.size * 4
    # in (x2 dbuf) + xa + f32 acc + out (x2 dbuf), per length column
    bytes_per_col = (3 * it) * c_in + (4 + 2 * it) * co_s
    budget = max(tile_budget - weight_bytes, 2 * 2**20)
    l_tile, use_halo = _pick_l_tile(L, bytes_per_col, budget, halo_w, max_l_tile)
    n_tiles = L // l_tile
    halo_src, lspec, rspec = _halo_specs(x, c_in, l_tile, halo_w, use_halo, L)
    est = weight_bytes + bytes_per_col * (l_tile + 2 * halo_w)

    kernel = partial(_upconv_kernel, ksize=ksize, l_tile=l_tile, halo=halo, halo_w=halo_w)
    return pl.pallas_call(
        kernel,
        out_shape=jax.ShapeDtypeStruct((B, co_s, L), compute_dtype),
        grid_spec=pltpu.PrefetchScalarGridSpec(
            num_scalar_prefetch=0,
            grid=(B, n_tiles),
            in_specs=[
                pl.BlockSpec((1, c_in, l_tile), lambda b, j: (b, 0, j)),
                lspec,
                rspec,
                pl.BlockSpec((ksize, co_s, c_in), lambda b, j: (0, 0, 0)),   # resident
                pl.BlockSpec((co_s, 1), lambda b, j: (0, 0)),                # resident
            ],
            out_specs=pl.BlockSpec((1, co_s, l_tile), lambda b, j: (b, 0, j)),
        ),
        compiler_params=_mosaic_params(est, vmem_cap),
    )(x, halo_src, halo_src, w_taps, bias)


def residual_stack_pallas(h, units, dilations, *, compute_dtype=jnp.bfloat16, max_l_tile=None):
    """All residual dilated units fused into ONE pallas_call.
    h: (B, C, S); units: list of (w1 (C,C,7), b1 (C,), w2 (C,C,1), b2 (C,))."""
    B, C, S = h.shape
    n_units = len(dilations)
    tile_budget, vmem_cap = _device_caps()
    total_halo = 3 * sum(dilations)
    halo_w = _halo_block_width(total_halo)

    h = h.astype(compute_dtype)
    w1s = jnp.stack([jnp.transpose(w1, (2, 0, 1)) for (w1, _, _, _) in units]
                    ).astype(compute_dtype)                      # (n_units, 7, C, C)
    b1s = jnp.stack([b1 for (_, b1, _, _) in units]).reshape(n_units, C, 1).astype(jnp.float32)
    w2s = jnp.stack([w2.reshape(C, C) for (_, _, w2, _) in units]
                    ).astype(compute_dtype)                      # (n_units, C, C)
    b2s = jnp.stack([b2 for (_, _, _, b2) in units]).reshape(n_units, C, 1).astype(jnp.float32)

    it = jnp.dtype(compute_dtype).itemsize
    weight_bytes = (w1s.size + w2s.size) * it + (b1s.size + b2s.size) * 4
    # in/out (x2 dbuf, compute dtype) + f32 cur/acc/r + bf16 xa, per length column
    bytes_per_col = (5 * it + 12) * C
    budget = max(tile_budget - weight_bytes, 2 * 2**20)
    l_tile, use_halo = _pick_l_tile(S, bytes_per_col, budget, halo_w, max_l_tile)
    n_tiles = S // l_tile
    halo_src, lspec, rspec = _halo_specs(h, C, l_tile, halo_w, use_halo, S)
    est = weight_bytes + bytes_per_col * (l_tile + 2 * halo_w)

    kernel = partial(_res_stack_kernel, dilations=tuple(dilations), l_tile=l_tile,
                     total_halo=total_halo, halo_w=halo_w, compute_dtype=compute_dtype)
    return pl.pallas_call(
        kernel,
        out_shape=jax.ShapeDtypeStruct((B, C, S), compute_dtype),
        grid_spec=pltpu.PrefetchScalarGridSpec(
            num_scalar_prefetch=0,
            grid=(B, n_tiles),
            in_specs=[
                pl.BlockSpec((1, C, l_tile), lambda b, j: (b, 0, j)),
                lspec,
                rspec,
                pl.BlockSpec((n_units, 7, C, C), lambda b, j: (0, 0, 0, 0)),  # resident
                pl.BlockSpec((n_units, C, 1), lambda b, j: (0, 0, 0)),
                pl.BlockSpec((n_units, C, C), lambda b, j: (0, 0, 0)),
                pl.BlockSpec((n_units, C, 1), lambda b, j: (0, 0, 0)),
            ],
            out_specs=pl.BlockSpec((1, C, l_tile), lambda b, j: (b, 0, j)),
        ),
        compiler_params=_mosaic_params(est, vmem_cap),
    )(h, halo_src, halo_src, w1s, b1s, w2s, b2s)


# ---------------------------------------------------------------------------
# Parameters (deterministic synthetic init; PyTorch shapes)
# ---------------------------------------------------------------------------
def init_decoder_block_params(key, in_channels, dilations, stride, scale=0.1):
    c_out = in_channels // 2
    kt = 2 * stride
    keys = jax.random.split(key, 2 + 4 * len(dilations))
    # PyTorch ConvTranspose1d weight layout: (C_in, C_out, K)
    wt_pt = scale * jax.random.normal(keys[0], (in_channels, c_out, kt), jnp.float32)
    bt = scale * jax.random.normal(keys[1], (c_out,), jnp.float32)
    units = []
    for i in range(len(dilations)):
        k0 = 2 + 4 * i
        w1 = scale * jax.random.normal(keys[k0 + 0], (c_out, c_out, 7), jnp.float32)
        b1 = scale * jax.random.normal(keys[k0 + 1], (c_out,), jnp.float32)
        w2 = scale * jax.random.normal(keys[k0 + 2], (c_out, c_out, 1), jnp.float32)
        b2 = scale * jax.random.normal(keys[k0 + 3], (c_out,), jnp.float32)
        units.append((w1, b1, w2, b2))
    return {"wt_pt": wt_pt, "bt": bt, "units": units}


# ---------------------------------------------------------------------------
# Forward pass (Pallas)
# ---------------------------------------------------------------------------
def _polyphase_transpose_weights(wt_pt, bt, stride):
    """Rewrite ConvTranspose1d(Cin, Cout, k=2s, stride=s, padding=ceil(s/2),
    output_padding=s%2) as an ordinary K=3 'same' conv with s*Cout output
    channels; per output position only 2 input samples are ever touched."""
    c_in, c_out, kt = wt_pt.shape
    p = math.ceil(stride / 2)                      # _get_strided_padding(stride)[1]
    pad_l = kt - 1 - p
    w_flip = jnp.flip(wt_pt, axis=-1).transpose(1, 0, 2)   # (Cout, Cin, kt)
    wc = jnp.zeros((stride, c_out, c_in, 3), w_flip.dtype)
    for r in range(stride):
        k0 = (pad_l - r) % stride
        d = (r + k0 - pad_l) // stride             # exact; always -1 or 0
        wc = wc.at[r, :, :, d + 1].set(w_flip[:, :, k0])
        wc = wc.at[r, :, :, d + 2].set(w_flip[:, :, k0 + stride])
    wc = wc.reshape(stride * c_out, c_in, 3)
    bc = jnp.tile(bt, stride)                      # (s*Cout,)
    return wc, bc


def decoder_block_forward(x, params, *, stride, dilations,
                          compute_dtype=jnp.bfloat16, max_l_tile=None):
    B, c_in, L = x.shape
    assert c_in % 2 == 0
    c_out = c_in // 2

    # LeakyReLU + ConvTranspose1d in polyphase form (fused pallas_call).
    wc, bc = _polyphase_transpose_weights(params["wt_pt"], params["bt"], stride)
    w_taps = jnp.transpose(wc, (2, 0, 1))                       # (3, s*c_out, c_in)
    y = upsample_conv_pallas(x.astype(compute_dtype), w_taps, bc,
                             compute_dtype=compute_dtype, max_l_tile=max_l_tile)
    # Phase interleave: y[:, r*c_out+c, t] -> h[:, c, t*stride+r].
    # TODO(synk): fuse this s-way lane interleave into the conv kernel output.
    h = y.reshape(B, stride, c_out, L).transpose(0, 2, 3, 1).reshape(B, c_out, L * stride)

    # All residual dilated units fused into one pallas_call.
    if dilations:
        h = residual_stack_pallas(h, params["units"], dilations,
                                  compute_dtype=compute_dtype, max_l_tile=max_l_tile)
    return h


# ---------------------------------------------------------------------------
# Pure-JAX (XLA) reference for correctness checking
# ---------------------------------------------------------------------------
def decoder_block_reference(x, params, *, stride, dilations):
    kt = 2 * stride
    p_t = math.ceil(stride / 2)
    op = stride % 2
    dn = ("NCH", "OIH", "NCH")
    w_t = jnp.flip(params["wt_pt"], axis=-1).transpose(1, 0, 2)
    h = _leaky(x)
    h = lax.conv_general_dilated(h, w_t, window_strides=(1,),
                                 padding=[(kt - 1 - p_t, kt - 1 - p_t + op)],
                                 lhs_dilation=(stride,), dimension_numbers=dn,
                                 precision=lax.Precision.HIGHEST)
    h = h + params["bt"][None, :, None]
    for (w1, b1, w2, b2), d in zip(params["units"], dilations):
        pad = d * 3
        r = _leaky(h)
        r = lax.conv_general_dilated(r, w1, (1,), [(pad, pad)],
                                     rhs_dilation=(d,), dimension_numbers=dn,
                                     precision=lax.Precision.HIGHEST)
        r = r + b1[None, :, None]
        r = _leaky(r)
        r = lax.conv_general_dilated(r, w2, (1,), [(0, 0)],
                                     dimension_numbers=dn,
                                     precision=lax.Precision.HIGHEST)
        r = r + b2[None, :, None]
        h = h + r
    return h


if __name__ == "__main__":
    def _run_case(seed, B, C_IN, L, stride, dilations, max_l_tile):
        kx, kp = jax.random.split(jax.random.PRNGKey(seed))
        x = jax.random.normal(kx, (B, C_IN, L), jnp.float32)
        params = init_decoder_block_params(kp, C_IN, dilations, stride)
        fwd = jax.jit(partial(decoder_block_forward, stride=stride,
                              dilations=dilations, max_l_tile=max_l_tile))
        out = jax.block_until_ready(fwd(x, params))
        assert out.shape == (B, C_IN // 2, L * stride), out.shape
        ref = decoder_block_reference(x, params, stride=stride, dilations=dilations)
        out32 = out.astype(jnp.float32)
        max_err = float(jnp.max(jnp.abs(out32 - ref)))
        # bf16 storage + single-pass bf16 MXU vs f32 HIGHEST reference.
        assert jnp.allclose(out32, ref, atol=2e-2, rtol=2e-2), max_err

    # Case 1: small, non-lane-aligned length -> single-tile (zero-halo) path.
    _run_case(0, B=2, C_IN=16, L=16, stride=2, dilations=[1, 3], max_l_tile=None)
    # Case 2: lane-aligned length with a forced small tile -> exercises the
    # multi-tile halo-block path (edge clamping + in-kernel edge masking).
    _run_case(1, B=1, C_IN=16, L=256, stride=2, dilations=[1, 3], max_l_tile=128)

    print("KERNEL_OK")
</pallas_src>

<mosaic_0001>
module attributes {stable_mosaic.version = 11 : i64} {
  func.func @_upconv_kernel(%arg0: i32, %arg1: i32, %arg2: memref<1x16x16xbf16, #tpu.memory_space<vmem>>, %arg3: memref<1x16x128xbf16, #tpu.memory_space<vmem>>, %arg4: memref<1x16x128xbf16, #tpu.memory_space<vmem>>, %arg5: memref<3x16x16xbf16, #tpu.memory_space<vmem>>, %arg6: memref<16x1xf32, #tpu.memory_space<vmem>>, %arg7: memref<1x16x16xbf16, #tpu.memory_space<vmem>>) attributes {dimension_semantics = [#tpu.dimension_semantics<parallel>, #tpu.dimension_semantics<parallel>], iteration_bounds = array<i64: 2, 1>, scalar_prefetch = 0 : i64, scratch_operands = 0 : i64, tpu.core_type = #tpu.core_type<tc>, window_params = [{transform_indices = @transform_0, window_bounds = array<i64: 1, 16, 16>}, {pipeline_mode = #tpu.pipeline_mode<synchronous>, transform_indices = @transform_1, window_bounds = array<i64: 1, 16, 128>}, {pipeline_mode = #tpu.pipeline_mode<synchronous>, transform_indices = @transform_2, window_bounds = array<i64: 1, 16, 128>}, {pipeline_mode = #tpu.pipeline_mode<synchronous>, transform_indices = @transform_3, window_bounds = array<i64: 3, 16, 16>}, {pipeline_mode = #tpu.pipeline_mode<synchronous>, transform_indices = @transform_4, window_bounds = array<i64: 16, 1>}, {transform_indices = @transform_5, window_bounds = array<i64: 1, 16, 16>}]} {
    %c0_i32 = arith.constant 0 : i32
    %0 = arith.cmpi sgt, %arg1, %c0_i32 : i32
    %1 = arith.extui %0 : i1 to i32
    %2 = arith.sitofp %1 : i32 to f32
    %3 = arith.truncf %2 : f32 to bf16
    %c1_i32 = arith.constant 1 : i32
    %4 = arith.addi %arg1, %c1_i32 : i32
    %c1_i32_0 = arith.constant 1 : i32
    %5 = arith.cmpi slt, %4, %c1_i32_0 : i32
    %6 = arith.extui %5 : i1 to i32
    %7 = arith.sitofp %6 : i32 to f32
    %8 = arith.truncf %7 : f32 to bf16
    %c0 = arith.constant 0 : index
    %c0_1 = arith.constant 0 : index
    %c0_2 = arith.constant 0 : index
    %9 = vector.load %arg3[%c0, %c0_1, %c0_2] : memref<1x16x128xbf16, #tpu.memory_space<vmem>>, vector<1x16x128xbf16>
    %10 = vector.shape_cast %9 : vector<1x16x128xbf16> to vector<16x128xbf16>
    %11 = vector.extract_strided_slice %10 {offsets = [0, 127], sizes = [16, 1], strides = [1, 1]} : vector<16x128xbf16> to vector<16x1xbf16>
    %12 = vector.broadcast %3 : bf16 to vector<16x1xbf16>
    %13 = arith.mulf %11, %12 : vector<16x1xbf16>
    %c0_3 = arith.constant 0 : index
    %c0_4 = arith.constant 0 : index
    %c0_5 = arith.constant 0 : index
    %14 = vector.load %arg4[%c0_3, %c0_4, %c0_5] : memref<1x16x128xbf16, #tpu.memory_space<vmem>>, vector<1x16x128xbf16>
    %15 = vector.shape_cast %14 : vector<1x16x128xbf16> to vector<16x128xbf16>
    %16 = vector.extract_strided_slice %15 {offsets = [0, 0], sizes = [16, 1], strides = [1, 1]} : vector<16x128xbf16> to vector<16x1xbf16>
    %17 = vector.broadcast %8 : bf16 to vector<16x1xbf16>
    %18 = arith.mulf %16, %17 : vector<16x1xbf16>
    %c0_6 = arith.constant 0 : index
    %c0_7 = arith.constant 0 : index
    %c0_8 = arith.constant 0 : index
    %19 = vector.load %arg2[%c0_6, %c0_7, %c0_8] : memref<1x16x16xbf16, #tpu.memory_space<vmem>>, vector<1x16x16xbf16>
    %20 = vector.shape_cast %19 : vector<1x16x16xbf16> to vector<16x16xbf16>
    %21 = tpu.concatenate %13, %20, %18 in 1 : vector<16x1xbf16>, vector<16x16xbf16>, vector<16x1xbf16> -> vector<16x18xbf16>
    %cst = arith.constant 0.000000e+00 : bf16
    %22 = vector.broadcast %cst : bf16 to vector<16x18xbf16>
    %23 = arith.cmpf oge, %21, %22 : vector<16x18xbf16>
    %cst_9 = arith.constant 1.000980e-02 : bf16
    %24 = vector.broadcast %cst_9 : bf16 to vector<16x18xbf16>
    %25 = arith.mulf %24, %21 : vector<16x18xbf16>
    %26 = arith.select %23, %21, %25 : vector<16x18xi1>, vector<16x18xbf16>
    %cst_10 = arith.constant 0.000000e+00 : f32
    %27 = vector.broadcast %cst_10 : f32 to vector<16x16xf32>
    %c0_11 = arith.constant 0 : index
    %c0_12 = arith.constant 0 : index
    %c0_13 = arith.constant 0 : index
    %28 = vector.load %arg5[%c0_11, %c0_12, %c0_13] : memref<3x16x16xbf16, #tpu.memory_space<vmem>>, vector<1x16x16xbf16>
    %29 = vector.shape_cast %28 : vector<1x16x16xbf16> to vector<16x16xbf16>
    %30 = vector.extract_strided_slice %26 {offsets = [0, 0], sizes = [16, 16], strides = [1, 1]} : vector<16x18xbf16> to vector<16x16xbf16>
    %cst_14 = arith.constant dense<0.000000e+00> : vector<16x16xf32>
    %31 = tpu.matmul %29, %30, %cst_14 {dimension_numbers = #tpu.dot_dimension_numbers<[1], [0], [0], [1], [0, 0, 1, 1], [], []>} : vector<16x16xbf16>, vector<16x16xbf16>, vector<16x16xf32> -> vector<16x16xf32>
    %32 = arith.addf %27, %31 : vector<16x16xf32>
    %c1 = arith.constant 1 : index
    %c0_15 = arith.constant 0 : index
    %c0_16 = arith.constant 0 : index
    %33 = vector.load %arg5[%c1, %c0_15, %c0_16] : memref<3x16x16xbf16, #tpu.memory_space<vmem>>, vector<1x16x16xbf16>
    %34 = vector.shape_cast %33 : vector<1x16x16xbf16> to vector<16x16xbf16>
    %35 = vector.extract_strided_slice %26 {offsets = [0, 1], sizes = [16, 16], strides = [1, 1]} : vector<16x18xbf16> to vector<16x16xbf16>
    %cst_17 = arith.constant dense<0.000000e+00> : vector<16x16xf32>
    %36 = tpu.matmul %34, %35, %cst_17 {dimension_numbers = #tpu.dot_dimension_numbers<[1], [0], [0], [1], [0, 0, 1, 1], [], []>} : vector<16x16xbf16>, vector<16x16xbf16>, vector<16x16xf32> -> vector<16x16xf32>
    %37 = arith.addf %32, %36 : vector<16x16xf32>
    %c2 = arith.constant 2 : index
    %c0_18 = arith.constant 0 : index
    %c0_19 = arith.constant 0 : index
    %38 = vector.load %arg5[%c2, %c0_18, %c0_19] : memref<3x16x16xbf16, #tpu.memory_space<vmem>>, vector<1x16x16xbf16>
    %39 = vector.shape_cast %38 : vector<1x16x16xbf16> to vector<16x16xbf16>
    %40 = vector.extract_strided_slice %26 {offsets = [0, 2], sizes = [16, 16], strides = [1, 1]} : vector<16x18xbf16> to vector<16x16xbf16>
    %cst_20 = arith.constant dense<0.000000e+00> : vector<16x16xf32>
    %41 = tpu.matmul %39, %40, %cst_20 {dimension_numbers = #tpu.dot_dimension_numbers<[1], [0], [0], [1], [0, 0, 1, 1], [], []>} : vector<16x16xbf16>, vector<16x16xbf16>, vector<16x16xf32> -> vector<16x16xf32>
    %42 = arith.addf %37, %41 : vector<16x16xf32>
    %c0_21 = arith.constant 0 : index
    %c0_22 = arith.constant 0 : index
    %43 = vector.load %arg6[%c0_21, %c0_22] : memref<16x1xf32, #tpu.memory_space<vmem>>, vector<16x1xf32>
    %44 = vector.broadcast %43 : vector<16x1xf32> to vector<16x16xf32>
    %45 = arith.addf %42, %44 : vector<16x16xf32>
    %46 = arith.truncf %45 : vector<16x16xf32> to vector<16x16xbf16>
    %c0_23 = arith.constant 0 : index
    %c0_24 = arith.constant 0 : index
    %c0_25 = arith.constant 0 : index
    %47 = vector.load %arg7[%c0_23, %c0_24, %c0_25] : memref<1x16x16xbf16, #tpu.memory_space<vmem>>, vector<1x16x16xbf16>
    %48 = vector.shape_cast %47 : vector<1x16x16xbf16> to vector<16x16xbf16>
    %49 = vector.shape_cast %46 : vector<16x16xbf16> to vector<1x16x16xbf16>
    tpu.vector_store %arg7[%c0_23, %c0_24, %c0_25], %49 {strides = array<i32>} : memref<1x16x16xbf16, #tpu.memory_space<vmem>>, vector<1x16x16xbf16>,
    return
  }
  func.func @transform_0(%arg0: i32, %arg1: i32) -> (i32, i32, i32) {
    %c0_i32 = arith.constant 0 : i32
    %c0_i32_0 = arith.constant 0 : i32
    return %arg0, %c0_i32, %arg1 : i32, i32, i32
  }
  func.func @transform_1(%arg0: i32, %arg1: i32) -> (i32, i32, i32) {
    %c0_i32 = arith.constant 0 : i32
    %c0_i32_0 = arith.constant 0 : i32
    %c0_i32_1 = arith.constant 0 : i32
    %c0_i32_2 = arith.constant 0 : i32
    return %c0_i32, %c0_i32_0, %c0_i32_1 : i32, i32, i32
  }
  func.func @transform_2(%arg0: i32, %arg1: i32) -> (i32, i32, i32) {
    %c0_i32 = arith.constant 0 : i32
    %c0_i32_0 = arith.constant 0 : i32
    %c0_i32_1 = arith.constant 0 : i32
    %c0_i32_2 = arith.constant 0 : i32
    return %c0_i32, %c0_i32_0, %c0_i32_1 : i32, i32, i32
  }
  func.func @transform_3(%arg0: i32, %arg1: i32) -> (i32, i32, i32) {
    %c0_i32 = arith.constant 0 : i32
    %c0_i32_0 = arith.constant 0 : i32
    %c0_i32_1 = arith.constant 0 : i32
    %c0_i32_2 = arith.constant 0 : i32
    return %c0_i32, %c0_i32_0, %c0_i32_1 : i32, i32, i32
  }
  func.func @transform_4(%arg0: i32, %arg1: i32) -> (i32, i32) {
    %c0_i32 = arith.constant 0 : i32
    %c0_i32_0 = arith.constant 0 : i32
    %c0_i32_1 = arith.constant 0 : i32
    return %c0_i32, %c0_i32_0 : i32, i32
  }
  func.func @transform_5(%arg0: i32, %arg1: i32) -> (i32, i32, i32) {
    %c0_i32 = arith.constant 0 : i32
    %c0_i32_0 = arith.constant 0 : i32
    return %arg0, %c0_i32, %arg1 : i32, i32, i32
  }
}

module attributes {stable_mosaic.version = 11 : i64} {
  func.func @_res_stack_kernel(%arg0: i32, %arg1: i32, %arg2: memref<1x8x32xbf16, #tpu.memory_space<vmem>>, %arg3: memref<1x8x128xbf16, #tpu.memory_space<vmem>>, %arg4: memref<1x8x128xbf16, #tpu.memory_space<vmem>>, %arg5: memref<2x7x8x8xbf16, #tpu.memory_space<vmem>>, %arg6: memref<2x8x1xf32, #tpu.memory_space<vmem>>, %arg7: memref<2x8x8xbf16, #tpu.memory_space<vmem>>, %arg8: memref<2x8x1xf32, #tpu.memory_space<vmem>>, %arg9: memref<1x8x32xbf16, #tpu.memory_space<vmem>>) attributes {dimension_semantics = [#tpu.dimension_semantics<parallel>, #tpu.dimension_semantics<parallel>], iteration_bounds = array<i64: 2, 1>, scalar_prefetch = 0 : i64, scratch_operands = 0 : i64, tpu.core_type = #tpu.core_type<tc>, window_params = [{transform_indices = @transform_0, window_bounds = array<i64: 1, 8, 32>}, {pipeline_mode = #tpu.pipeline_mode<synchronous>, transform_indices = @transform_1, window_bounds = array<i64: 1, 8, 128>}, {pipeline_mode = #tpu.pipeline_mode<synchronous>, transform_indices = @transform_2, window_bounds = array<i64: 1, 8, 128>}, {pipeline_mode = #tpu.pipeline_mode<synchronous>, transform_indices = @transform_3, window_bounds = array<i64: 2, 7, 8, 8>}, {pipeline_mode = #tpu.pipeline_mode<synchronous>, transform_indices = @transform_4, window_bounds = array<i64: 2, 8, 1>}, {pipeline_mode = #tpu.pipeline_mode<synchronous>, transform_indices = @transform_5, window_bounds = array<i64: 2, 8, 8>}, {pipeline_mode = #tpu.pipeline_mode<synchronous>, transform_indices = @transform_6, window_bounds = array<i64: 2, 8, 1>}, {transform_indices = @transform_7, window_bounds = array<i64: 1, 8, 32>}]} {
    %c0_i32 = arith.constant 0 : i32
    %0 = arith.cmpi sgt, %arg1, %c0_i32 : i32
    %1 = arith.extui %0 : i1 to i32
    %2 = arith.sitofp %1 : i32 to f32
    %3 = arith.truncf %2 : f32 to bf16
    %c1_i32 = arith.constant 1 : i32
    %4 = arith.addi %arg1, %c1_i32 : i32
    %c1_i32_0 = arith.constant 1 : i32
    %5 = arith.cmpi slt, %4, %c1_i32_0 : i32
    %6 = arith.extui %5 : i1 to i32
    %7 = arith.sitofp %6 : i32 to f32
    %8 = arith.truncf %7 : f32 to bf16
    %c0 = arith.constant 0 : index
    %c0_1 = arith.constant 0 : index
    %c0_2 = arith.constant 0 : index
    %9 = vector.load %arg3[%c0, %c0_1, %c0_2] : memref<1x8x128xbf16, #tpu.memory_space<vmem>>, vector<1x8x128xbf16>
    %10 = vector.shape_cast %9 : vector<1x8x128xbf16> to vector<8x128xbf16>
    %11 = vector.extract_strided_slice %10 {offsets = [0, 116], sizes = [8, 12], strides = [1, 1]} : vector<8x128xbf16> to vector<8x12xbf16>
    %12 = vector.broadcast %3 : bf16 to vector<8x12xbf16>
    %13 = arith.mulf %11, %12 : vector<8x12xbf16>
    %c0_3 = arith.constant 0 : index
    %c0_4 = arith.constant 0 : index
    %c0_5 = arith.constant 0 : index
    %14 = vector.load %arg4[%c0_3, %c0_4, %c0_5] : memref<1x8x128xbf16, #tpu.memory_space<vmem>>, vector<1x8x128xbf16>
    %15 = vector.shape_cast %14 : vector<1x8x128xbf16> to vector<8x128xbf16>
    %16 = vector.extract_strided_slice %15 {offsets = [0, 0], sizes = [8, 12], strides = [1, 1]} : vector<8x128xbf16> to vector<8x12xbf16>
    %17 = vector.broadcast %8 : bf16 to vector<8x12xbf16>
    %18 = arith.mulf %16, %17 : vector<8x12xbf16>
    %c0_6 = arith.constant 0 : index
    %c0_7 = arith.constant 0 : index
    %c0_8 = arith.constant 0 : index
    %19 = vector.load %arg2[%c0_6, %c0_7, %c0_8] : memref<1x8x32xbf16, #tpu.memory_space<vmem>>, vector<1x8x32xbf16>
    %20 = vector.shape_cast %19 : vector<1x8x32xbf16> to vector<8x32xbf16>
    %21 = tpu.concatenate %13, %20, %18 in 1 : vector<8x12xbf16>, vector<8x32xbf16>, vector<8x12xbf16> -> vector<8x56xbf16>
    %22 = arith.extf %21 : vector<8x56xbf16> to vector<8x56xf32>
    %cst = arith.constant 0.000000e+00 : f32
    %23 = vector.broadcast %cst : f32 to vector<8x56xf32>
    %24 = arith.cmpf oge, %22, %23 : vector<8x56xf32>
    %cst_9 = arith.constant 0.00999999977 : f32
    %25 = vector.broadcast %cst_9 : f32 to vector<8x56xf32>
    %26 = arith.mulf %25, %22 : vector<8x56xf32>
    %27 = arith.select %24, %22, %26 : vector<8x56xi1>, vector<8x56xf32>
    %28 = arith.truncf %27 : vector<8x56xf32> to vector<8x56xbf16>
    %cst_10 = arith.constant 0.000000e+00 : f32
    %29 = vector.broadcast %cst_10 : f32 to vector<8x50xf32>
    %c0_11 = arith.constant 0 : index
    %c0_12 = arith.constant 0 : index
    %c0_13 = arith.constant 0 : index
    %c0_14 = arith.constant 0 : index
    %30 = vector.load %arg5[%c0_11, %c0_12, %c0_13, %c0_14] : memref<2x7x8x8xbf16, #tpu.memory_space<vmem>>, vector<1x1x8x8xbf16>
    %31 = vector.shape_cast %30 : vector<1x1x8x8xbf16> to vector<8x8xbf16>
    %32 = vector.extract_strided_slice %28 {offsets = [0, 0], sizes = [8, 50], strides = [1, 1]} : vector<8x56xbf16> to vector<8x50xbf16>
    %cst_15 = arith.constant dense<0.000000e+00> : vector<8x50xf32>
    %33 = tpu.matmul %31, %32, %cst_15 {dimension_numbers = #tpu.dot_dimension_numbers<[1], [0], [0], [1], [0, 0, 1, 1], [], []>} : vector<8x8xbf16>, vector<8x50xbf16>, vector<8x50xf32> -> vector<8x50xf32>
    %34 = arith.addf %29, %33 : vector<8x50xf32>
    %c0_16 = arith.constant 0 : index
    %c1 = arith.constant 1 : index
    %c0_17 = arith.constant 0 : index
    %c0_18 = arith.constant 0 : index
    %35 = vector.load %arg5[%c0_16, %c1, %c0_17, %c0_18] : memref<2x7x8x8xbf16, #tpu.memory_space<vmem>>, vector<1x1x8x8xbf16>
    %36 = vector.shape_cast %35 : vector<1x1x8x8xbf16> to vector<8x8xbf16>
    %37 = vector.extract_strided_slice %28 {offsets = [0, 1], sizes = [8, 50], strides = [1, 1]} : vector<8x56xbf16> to vector<8x50xbf16>
    %cst_19 = arith.constant dense<0.000000e+00> : vector<8x50xf32>
    %38 = tpu.matmul %36, %37, %cst_19 {dimension_numbers = #tpu.dot_dimension_numbers<[1], [0], [0], [1], [0, 0, 1, 1], [], []>} : vector<8x8xbf16>, vector<8x50xbf16>, vector<8x50xf32> -> vector<8x50xf32>
    %39 = arith.addf %34, %38 : vector<8x50xf32>
    %c0_20 = arith.constant 0 : index
    %c2 = arith.constant 2 : index
    %c0_21 = arith.constant 0 : index
    %c0_22 = arith.constant 0 : index
    %40 = vector.load %arg5[%c0_20, %c2, %c0_21, %c0_22] : memref<2x7x8x8xbf16, #tpu.memory_space<vmem>>, vector<1x1x8x8xbf16>
    %41 = vector.shape_cast %40 : vector<1x1x8x8xbf16> to vector<8x8xbf16>
    %42 = vector.extract_strided_slice %28 {offsets = [0, 2], sizes = [8, 50], strides = [1, 1]} : vector<8x56xbf16> to vector<8x50xbf16>
    %cst_23 = arith.constant dense<0.000000e+00> : vector<8x50xf32>
    %43 = tpu.matmul %41, %42, %cst_23 {dimension_numbers = #tpu.dot_dimension_numbers<[1], [0], [0], [1], [0, 0, 1, 1], [], []>} : vector<8x8xbf16>, vector<8x50xbf16>, vector<8x50xf32> -> vector<8x50xf32>
    %44 = arith.addf %39, %43 : vector<8x50xf32>
    %c0_24 = arith.constant 0 : index
    %c3 = arith.constant 3 : index
    %c0_25 = arith.constant 0 : index
    %c0_26 = arith.constant 0 : index
    %45 = vector.load %arg5[%c0_24, %c3, %c0_25, %c0_26] : memref<2x7x8x8xbf16, #tpu.memory_space<vmem>>, vector<1x1x8x8xbf16>
    %46 = vector.shape_cast %45 : vector<1x1x8x8xbf16> to vector<8x8xbf16>
    %47 = vector.extract_strided_slice %28 {offsets = [0, 3], sizes = [8, 50], strides = [1, 1]} : vector<8x56xbf16> to vector<8x50xbf16>
    %cst_27 = arith.constant dense<0.000000e+00> : vector<8x50xf32>
    %48 = tpu.matmul %46, %47, %cst_27 {dimension_numbers = #tpu.dot_dimension_numbers<[1], [0], [0], [1], [0, 0, 1, 1], [], []>} : vector<8x8xbf16>, vector<8x50xbf16>, vector<8x50xf32> -> vector<8x50xf32>
    %49 = arith.addf %44, %48 : vector<8x50xf32>
    %c0_28 = arith.constant 0 : index
    %c4 = arith.constant 4 : index
    %c0_29 = arith.constant 0 : index
    %c0_30 = arith.constant 0 : index
    %50 = vector.load %arg5[%c0_28, %c4, %c0_29, %c0_30] : memref<2x7x8x8xbf16, #tpu.memory_space<vmem>>, vector<1x1x8x8xbf16>
    %51 = vector.shape_cast %50 : vector<1x1x8x8xbf16> to vector<8x8xbf16>
    %52 = vector.extract_strided_slice %28 {offsets = [0, 4], sizes = [8, 50], strides = [1, 1]} : vector<8x56xbf16> to vector<8x50xbf16>
    %cst_31 = arith.constant dense<0.000000e+00> : vector<8x50xf32>
    %53 = tpu.matmul %51, %52, %cst_31 {dimension_numbers = #tpu.dot_dimension_numbers<[1], [0], [0], [1], [0, 0, 1, 1], [], []>} : vector<8x8xbf16>, vector<8x50xbf16>, vector<8x50xf32> -> vector<8x50xf32>
    %54 = arith.addf %49, %53 : vector<8x50xf32>
    %c0_32 = arith.constant 0 : index
    %c5 = arith.constant 5 : index
    %c0_33 = arith.constant 0 : index
    %c0_34 = arith.constant 0 : index
    %55 = vector.load %arg5[%c0_32, %c5, %c0_33, %c0_34] : memref<2x7x8x8xbf16, #tpu.memory_space<vmem>>, vector<1x1x8x8xbf16>
    %56 = vector.shape_cast %55 : vector<1x1x8x8xbf16> to vector<8x8xbf16>
    %57 = vector.extract_strided_slice %28 {offsets = [0, 5], sizes = [8, 50], strides = [1, 1]} : vector<8x56xbf16> to vector<8x50xbf16>
    %cst_35 = arith.constant dense<0.000000e+00> : vector<8x50xf32>
    %58 = tpu.matmul %56, %57, %cst_35 {dimension_numbers = #tpu.dot_dimension_numbers<[1], [0], [0], [1], [0, 0, 1, 1], [], []>} : vector<8x8xbf16>, vector<8x50xbf16>, vector<8x50xf32> -> vector<8x50xf32>
    %59 = arith.addf %54, %58 : vector<8x50xf32>
    %c0_36 = arith.constant 0 : index
    %c6 = arith.constant 6 : index
    %c0_37 = arith.constant 0 : index
    %c0_38 = arith.constant 0 : index
    %60 = vector.load %arg5[%c0_36, %c6, %c0_37, %c0_38] : memref<2x7x8x8xbf16, #tpu.memory_space<vmem>>, vector<1x1x8x8xbf16>
    %61 = vector.shape_cast %60 : vector<1x1x8x8xbf16> to vector<8x8xbf16>
    %62 = vector.extract_strided_slice %28 {offsets = [0, 6], sizes = [8, 50], strides = [1, 1]} : vector<8x56xbf16> to vector<8x50xbf16>
    %cst_39 = arith.constant dense<0.000000e+00> : vector<8x50xf32>
    %63 = tpu.matmul %61, %62, %cst_39 {dimension_numbers = #tpu.dot_dimension_numbers<[1], [0], [0], [1], [0, 0, 1, 1], [], []>} : vector<8x8xbf16>, vector<8x50xbf16>, vector<8x50xf32> -> vector<8x50xf32>
    %64 = arith.addf %59, %63 : vector<8x50xf32>
    %c0_40 = arith.constant 0 : index
    %c0_41 = arith.constant 0 : index
    %c0_42 = arith.constant 0 : index
    %65 = vector.load %arg6[%c0_40, %c0_41, %c0_42] : memref<2x8x1xf32, #tpu.memory_space<vmem>>, vector<1x8x1xf32>
    %66 = vector.shape_cast %65 : vector<1x8x1xf32> to vector<8x1xf32>
    %67 = vector.broadcast %66 : vector<8x1xf32> to vector<8x50xf32>
    %68 = arith.addf %64, %67 : vector<8x50xf32>
    %cst_43 = arith.constant 0.000000e+00 : f32
    %69 = vector.broadcast %cst_43 : f32 to vector<8x50xf32>
    %70 = arith.cmpf oge, %68, %69 : vector<8x50xf32>
    %cst_44 = arith.constant 0.00999999977 : f32
    %71 = vector.broadcast %cst_44 : f32 to vector<8x50xf32>
    %72 = arith.mulf %71, %68 : vector<8x50xf32>
    %73 = arith.select %70, %68, %72 : vector<8x50xi1>, vector<8x50xf32>
    %74 = arith.truncf %73 : vector<8x50xf32> to vector<8x50xbf16>
    %c0_45 = arith.constant 0 : index
    %c0_46 = arith.constant 0 : index
    %c0_47 = arith.constant 0 : index
    %75 = vector.load %arg7[%c0_45, %c0_46, %c0_47] : memref<2x8x8xbf16, #tpu.memory_space<vmem>>, vector<1x8x8xbf16>
    %76 = vector.shape_cast %75 : vector<1x8x8xbf16> to vector<8x8xbf16>
    %cst_48 = arith.constant dense<0.000000e+00> : vector<8x50xf32>
    %77 = tpu.matmul %76, %74, %cst_48 {dimension_numbers = #tpu.dot_dimension_numbers<[1], [0], [0], [1], [0, 0, 1, 1], [], []>} : vector<8x8xbf16>, vector<8x50xbf16>, vector<8x50xf32> -> vector<8x50xf32>
    %c0_49 = arith.constant 0 : index
    %c0_50 = arith.constant 0 : index
    %c0_51 = arith.constant 0 : index
    %78 = vector.load %arg8[%c0_49, %c0_50, %c0_51] : memref<2x8x1xf32, #tpu.memory_space<vmem>>, vector<1x8x1xf32>
    %79 = vector.shape_cast %78 : vector<1x8x1xf32> to vector<8x1xf32>
    %80 = vector.broadcast %79 : vector<8x1xf32> to vector<8x50xf32>
    %81 = arith.addf %77, %80 : vector<8x50xf32>
    %82 = vector.extract_strided_slice %22 {offsets = [0, 3], sizes = [8, 50], strides = [1, 1]} : vector<8x56xf32> to vector<8x50xf32>
    %83 = arith.addf %82, %81 : vector<8x50xf32>
    %84 = tpu.iota {dimensions = array<i32: 1>} : vector<1x50xi32>
    %c32_i32 = arith.constant 32 : i32
    %85 = arith.muli %arg1, %c32_i32 : i32
    %c9_i32 = arith.constant 9 : i32
    %86 = arith.subi %85, %c9_i32 : i32
    %87 = vector.broadcast %86 : i32 to vector<1x50xi32>
    %88 = arith.addi %87, %84 : vector<1x50xi32>
    %c0_i32_52 = arith.constant 0 : i32
    %89 = vector.broadcast %c0_i32_52 : i32 to vector<1x50xi32>
    %90 = arith.cmpi sge, %88, %89 : vector<1x50xi32>
    %c32_i32_53 = arith.constant 32 : i32
    %91 = vector.broadcast %c32_i32_53 : i32 to vector<1x50xi32>
    %92 = arith.cmpi slt, %88, %91 : vector<1x50xi32>
    %93 = arith.andi %90, %92 : vector<1x50xi1>
    %cst_54 = arith.constant 0.000000e+00 : f32
    %94 = vector.shape_cast %93 : vector<1x50xi1> to vector<1x50xi1>
    %95 = vector.broadcast %94 : vector<1x50xi1> to vector<8x50xi1>
    %96 = vector.broadcast %cst_54 : f32 to vector<8x50xf32>
    %97 = arith.select %95, %83, %96 : vector<8x50xi1>, vector<8x50xf32>
    %cst_55 = arith.constant 0.000000e+00 : f32
    %98 = vector.broadcast %cst_55 : f32 to vector<8x50xf32>
    %99 = arith.cmpf oge, %97, %98 : vector<8x50xf32>
    %cst_56 = arith.constant 0.00999999977 : f32
    %100 = vector.broadcast %cst_56 : f32 to vector<8x50xf32>
    %101 = arith.mulf %100, %97 : vector<8x50xf32>
    %102 = arith.select %99, %97, %101 : vector<8x50xi1>, vector<8x50xf32>
    %103 = arith.truncf %102 : vector<8x50xf32> to vector<8x50xbf16>
    %cst_57 = arith.constant 0.000000e+00 : f32
    %104 = vector.broadcast %cst_57 : f32 to vector<8x32xf32>
    %c1_58 = arith.constant 1 : index
    %c0_59 = arith.constant 0 : index
    %c0_60 = arith.constant 0 : index
    %c0_61 = arith.constant 0 : index
    %105 = vector.load %arg5[%c1_58, %c0_59, %c0_60, %c0_61] : memref<2x7x8x8xbf16, #tpu.memory_space<vmem>>, vector<1x1x8x8xbf16>
    %106 = vector.shape_cast %105 : vector<1x1x8x8xbf16> to vector<8x8xbf16>
    %107 = vector.extract_strided_slice %103 {offsets = [0, 0], sizes = [8, 32], strides = [1, 1]} : vector<8x50xbf16> to vector<8x32xbf16>
    %cst_62 = arith.constant dense<0.000000e+00> : vector<8x32xf32>
    %108 = tpu.matmul %106, %107, %cst_62 {dimension_numbers = #tpu.dot_dimension_numbers<[1], [0], [0], [1], [0, 0, 1, 1], [], []>} : vector<8x8xbf16>, vector<8x32xbf16>, vector<8x32xf32> -> vector<8x32xf32>
    %109 = arith.addf %104, %108 : vector<8x32xf32>
    %c1_63 = arith.constant 1 : index
    %c1_64 = arith.constant 1 : index
    %c0_65 = arith.constant 0 : index
    %c0_66 = arith.constant 0 : index
    %110 = vector.load %arg5[%c1_63, %c1_64, %c0_65, %c0_66] : memref<2x7x8x8xbf16, #tpu.memory_space<vmem>>, vector<1x1x8x8xbf16>
    %111 = vector.shape_cast %110 : vector<1x1x8x8xbf16> to vector<8x8xbf16>
    %112 = vector.extract_strided_slice %103 {offsets = [0, 3], sizes = [8, 32], strides = [1, 1]} : vector<8x50xbf16> to vector<8x32xbf16>
    %cst_67 = arith.constant dense<0.000000e+00> : vector<8x32xf32>
    %113 = tpu.matmul %111, %112, %cst_67 {dimension_numbers = #tpu.dot_dimension_numbers<[1], [0], [0], [1], [0, 0, 1, 1], [], []>} : vector<8x8xbf16>, vector<8x32xbf16>, vector<8x32xf32> -> vector<8x32xf32>
    %114 = arith.addf %109, %113 : vector<8x32xf32>
    %c1_68 = arith.constant 1 : index
    %c2_69 = arith.constant 2 : index
    %c0_70 = arith.constant 0 : index
    %c0_71 = arith.constant 0 : index
    %115 = vector.load %arg5[%c1_68, %c2_69, %c0_70, %c0_71] : memref<2x7x8x8xbf16, #tpu.memory_space<vmem>>, vector<1x1x8x8xbf16>
    %116 = vector.shape_cast %115 : vector<1x1x8x8xbf16> to vector<8x8xbf16>
    %117 = vector.extract_strided_slice %103 {offsets = [0, 6], sizes = [8, 32], strides = [1, 1]} : vector<8x50xbf16> to vector<8x32xbf16>
    %cst_72 = arith.constant dense<0.000000e+00> : vector<8x32xf32>
    %118 = tpu.matmul %116, %117, %cst_72 {dimension_numbers = #tpu.dot_dimension_numbers<[1], [0], [0], [1], [0, 0, 1, 1], [], []>} : vector<8x8xbf16>, vector<8x32xbf16>, vector<8x32xf32> -> vector<8x32xf32>
    %119 = arith.addf %114, %118 : vector<8x32xf32>
    %c1_73 = arith.constant 1 : index
    %c3_74 = arith.constant 3 : index
    %c0_75 = arith.constant 0 : index
    %c0_76 = arith.constant 0 : index
    %120 = vector.load %arg5[%c1_73, %c3_74, %c0_75, %c0_76] : memref<2x7x8x8xbf16, #tpu.memory_space<vmem>>, vector<1x1x8x8xbf16>
    %121 = vector.shape_cast %120 : vector<1x1x8x8xbf16> to vector<8x8xbf16>
    %122 = vector.extract_strided_slice %103 {offsets = [0, 9], sizes = [8, 32], strides = [1, 1]} : vector<8x50xbf16> to vector<8x32xbf16>
    %cst_77 = arith.constant dense<0.000000e+00> : vector<8x32xf32>
    %123 = tpu.matmul %121, %122, %cst_77 {dimension_numbers = #tpu.dot_dimension_numbers<[1], [0], [0], [1], [0, 0, 1, 1], [], []>} : vector<8x8xbf16>, vector<8x32xbf16>, vector<8x32xf32> -> vector<8x32xf32>
    %124 = arith.addf %119, %123 : vector<8x32xf32>
    %c1_78 = arith.constant 1 : index
    %c4_79 = arith.constant 4 : index
    %c0_80 = arith.constant 0 : index
    %c0_81 = arith.constant 0 : index
    %125 = vector.load %arg5[%c1_78, %c4_79, %c0_80, %c0_81] : memref<2x7x8x8xbf16, #tpu.memory_space<vmem>>, vector<1x1x8x8xbf16>
    %126 = vector.shape_cast %125 : vector<1x1x8x8xbf16> to vector<8x8xbf16>
    %127 = vector.extract_strided_slice %103 {offsets = [0, 12], sizes = [8, 32], strides = [1, 1]} : vector<8x50xbf16> to vector<8x32xbf16>
    %cst_82 = arith.constant dense<0.000000e+00> : vector<8x32xf32>
    %128 = tpu.matmul %126, %127, %cst_82 {dimension_numbers = #tpu.dot_dimension_numbers<[1], [0], [0], [1], [0, 0, 1, 1], [], []>} : vector<8x8xbf16>, vector<8x32xbf16>, vector<8x32xf32> -> vector<8x32xf32>
    %129 = arith.addf %124, %128 : vector<8x32xf32>
    %c1_83 = arith.constant 1 : index
    %c5_84 = arith.constant 5 : index
    %c0_85 = arith.constant 0 : index
    %c0_86 = arith.constant 0 : index
    %130 = vector.load %arg5[%c1_83, %c5_84, %c0_85, %c0_86] : memref<2x7x8x8xbf16, #tpu.memory_space<vmem>>, vector<1x1x8x8xbf16>
    %131 = vector.shape_cast %130 : vector<1x1x8x8xbf16> to vector<8x8xbf16>
    %132 = vector.extract_strided_slice %103 {offsets = [0, 15], sizes = [8, 32], strides = [1, 1]} : vector<8x50xbf16> to vector<8x32xbf16>
    %cst_87 = arith.constant dense<0.000000e+00> : vector<8x32xf32>
    %133 = tpu.matmul %131, %132, %cst_87 {dimension_numbers = #tpu.dot_dimension_numbers<[1], [0], [0], [1], [0, 0, 1, 1], [], []>} : vector<8x8xbf16>, vector<8x32xbf16>, vector<8x32xf32> -> vector<8x32xf32>
    %134 = arith.addf %129, %133 : vector<8x32xf32>
    %c1_88 = arith.constant 1 : index
    %c6_89 = arith.constant 6 : index
    %c0_90 = arith.constant 0 : index
    %c0_91 = arith.constant 0 : index
    %135 = vector.load %arg5[%c1_88, %c6_89, %c0_90, %c0_91] : memref<2x7x8x8xbf16, #tpu.memory_space<vmem>>, vector<1x1x8x8xbf16>
    %136 = vector.shape_cast %135 : vector<1x1x8x8xbf16> to vector<8x8xbf16>
    %137 = vector.extract_strided_slice %103 {offsets = [0, 18], sizes = [8, 32], strides = [1, 1]} : vector<8x50xbf16> to vector<8x32xbf16>
    %cst_92 = arith.constant dense<0.000000e+00> : vector<8x32xf32>
    %138 = tpu.matmul %136, %137, %cst_92 {dimension_numbers = #tpu.dot_dimension_numbers<[1], [0], [0], [1], [0, 0, 1, 1], [], []>} : vector<8x8xbf16>, vector<8x32xbf16>, vector<8x32xf32> -> vector<8x32xf32>
    %139 = arith.addf %134, %138 : vector<8x32xf32>
    %c1_93 = arith.constant 1 : index
    %c0_94 = arith.constant 0 : index
    %c0_95 = arith.constant 0 : index
    %140 = vector.load %arg6[%c1_93, %c0_94, %c0_95] : memref<2x8x1xf32, #tpu.memory_space<vmem>>, vector<1x8x1xf32>
    %141 = vector.shape_cast %140 : vector<1x8x1xf32> to vector<8x1xf32>
    %142 = vector.broadcast %141 : vector<8x1xf32> to vector<8x32xf32>
    %143 = arith.addf %139, %142 : vector<8x32xf32>
    %cst_96 = arith.constant 0.000000e+00 : f32
    %144 = vector.broadcast %cst_96 : f32 to vector<8x32xf32>
    %145 = arith.cmpf oge, %143, %144 : vector<8x32xf32>
    %cst_97 = arith.constant 0.00999999977 : f32
    %146 = vector.broadcast %cst_97 : f32 to vector<8x32xf32>
    %147 = arith.mulf %146, %143 : vector<8x32xf32>
    %148 = arith.select %145, %143, %147 : vector<8x32xi1>, vector<8x32xf32>
    %149 = arith.truncf %148 : vector<8x32xf32> to vector<8x32xbf16>
    %c1_98 = arith.constant 1 : index
    %c0_99 = arith.constant 0 : index
    %c0_100 = arith.constant 0 : index
    %150 = vector.load %arg7[%c1_98, %c0_99, %c0_100] : memref<2x8x8xbf16, #tpu.memory_space<vmem>>, vector<1x8x8xbf16>
    %151 = vector.shape_cast %150 : vector<1x8x8xbf16> to vector<8x8xbf16>
    %cst_101 = arith.constant dense<0.000000e+00> : vector<8x32xf32>
    %152 = tpu.matmul %151, %149, %cst_101 {dimension_numbers = #tpu.dot_dimension_numbers<[1], [0], [0], [1], [0, 0, 1, 1], [], []>} : vector<8x8xbf16>, vector<8x32xbf16>, vector<8x32xf32> -> vector<8x32xf32>
    %c1_102 = arith.constant 1 : index
    %c0_103 = arith.constant 0 : index
    %c0_104 = arith.constant 0 : index
    %153 = vector.load %arg8[%c1_102, %c0_103, %c0_104] : memref<2x8x1xf32, #tpu.memory_space<vmem>>, vector<1x8x1xf32>
    %154 = vector.shape_cast %153 : vector<1x8x1xf32> to vector<8x1xf32>
    %155 = vector.broadcast %154 : vector<8x1xf32> to vector<8x32xf32>
    %156 = arith.addf %152, %155 : vector<8x32xf32>
    %157 = vector.extract_strided_slice %97 {offsets = [0, 9], sizes = [8, 32], strides = [1, 1]} : vector<8x50xf32> to vector<8x32xf32>
    %158 = arith.addf %157, %156 : vector<8x32xf32>
    %159 = tpu.iota {dimensions = array<i32: 1>} : vector<1x32xi32>
    %c32_i32_105 = arith.constant 32 : i32
    %160 = arith.muli %arg1, %c32_i32_105 : i32
    %c0_i32_106 = arith.constant 0 : i32
    %161 = arith.subi %160, %c0_i32_106 : i32
    %162 = vector.broadcast %161 : i32 to vector<1x32xi32>
    %163 = arith.addi %162, %159 : vector<1x32xi32>
    %c0_i32_107 = arith.constant 0 : i32
    %164 = vector.broadcast %c0_i32_107 : i32 to vector<1x32xi32>
    %165 = arith.cmpi sge, %163, %164 : vector<1x32xi32>
    %c32_i32_108 = arith.constant 32 : i32
    %166 = vector.broadcast %c32_i32_108 : i32 to vector<1x32xi32>
    %167 = arith.cmpi slt, %163, %166 : vector<1x32xi32>
    %168 = arith.andi %165, %167 : vector<1x32xi1>
    %cst_109 = arith.constant 0.000000e+00 : f32
    %169 = vector.shape_cast %168 : vector<1x32xi1> to vector<1x32xi1>
    %170 = vector.broadcast %169 : vector<1x32xi1> to vector<8x32xi1>
    %171 = vector.broadcast %cst_109 : f32 to vector<8x32xf32>
    %172 = arith.select %170, %158, %171 : vector<8x32xi1>, vector<8x32xf32>
    %173 = arith.truncf %172 : vector<8x32xf32> to vector<8x32xbf16>
    %c0_110 = arith.constant 0 : index
    %c0_111 = arith.constant 0 : index
    %c0_112 = arith.constant 0 : index
    %174 = vector.load %arg9[%c0_110, %c0_111, %c0_112] : memref<1x8x32xbf16, #tpu.memory_space<vmem>>, vector<1x8x32xbf16>
    %175 = vector.shape_cast %174 : vector<1x8x32xbf16> to vector<8x32xbf16>
    %176 = vector.shape_cast %173 : vector<8x32xbf16> to vector<1x8x32xbf16>
    tpu.vector_store %arg9[%c0_110, %c0_111, %c0_112], %176 {strides = array<i32>} : memref<1x8x32xbf16, #tpu.memory_space<vmem>>, vector<1x8x32xbf16>,
    return
  }
  func.func @transform_0(%arg0: i32, %arg1: i32) -> (i32, i32, i32) {
    %c0_i32 = arith.constant 0 : i32
    %c0_i32_0 = arith.constant 0 : i32
    return %arg0, %c0_i32, %arg1 : i32, i32, i32
  }
  func.func @transform_1(%arg0: i32, %arg1: i32) -> (i32, i32, i32) {
    %c0_i32 = arith.constant 0 : i32
    %c0_i32_0 = arith.constant 0 : i32
    %c0_i32_1 = arith.constant 0 : i32
    %c0_i32_2 = arith.constant 0 : i32
    return %c0_i32, %c0_i32_0, %c0_i32_1 : i32, i32, i32
  }
  func.func @transform_2(%arg0: i32, %arg1: i32) -> (i32, i32, i32) {
    %c0_i32 = arith.constant 0 : i32
    %c0_i32_0 = arith.constant 0 : i32
    %c0_i32_1 = arith.constant 0 : i32
    %c0_i32_2 = arith.constant 0 : i32
    return %c0_i32, %c0_i32_0, %c0_i32_1 : i32, i32, i32
  }
  func.func @transform_3(%arg0: i32, %arg1: i32) -> (i32, i32, i32, i32) {
    %c0_i32 = arith.constant 0 : i32
    %c0_i32_0 = arith.constant 0 : i32
    %c0_i32_1 = arith.constant 0 : i32
    %c0_i32_2 = arith.constant 0 : i32
    %c0_i32_3 = arith.constant 0 : i32
    return %c0_i32, %c0_i32_0, %c0_i32_1, %c0_i32_2 : i32, i32, i32, i32
  }
  func.func @transform_4(%arg0: i32, %arg1: i32) -> (i32, i32, i32) {
    %c0_i32 = arith.constant 0 : i32
    %c0_i32_0 = arith.constant 0 : i32
    %c0_i32_1 = arith.constant 0 : i32
    %c0_i32_2 = arith.constant 0 : i32
    return %c0_i32, %c0_i32_0, %c0_i32_1 : i32, i32, i32
  }
  func.func @transform_5(%arg0: i32, %arg1: i32) -> (i32, i32, i32) {
    %c0_i32 = arith.constant 0 : i32
    %c0_i32_0 = arith.constant 0 : i32
    %c0_i32_1 = arith.constant 0 : i32
    %c0_i32_2 = arith.constant 0 : i32
    return %c0_i32, %c0_i32_0, %c0_i32_1 : i32, i32, i32
  }
  func.func @transform_6(%arg0: i32, %arg1: i32) -> (i32, i32, i32) {
    %c0_i32 = arith.constant 0 : i32
    %c0_i32_0 = arith.constant 0 : i32
    %c0_i32_1 = arith.constant 0 : i32
    %c0_i32_2 = arith.constant 0 : i32
    return %c0_i32, %c0_i32_0, %c0_i32_1 : i32, i32, i32
  }
  func.func @transform_7(%arg0: i32, %arg1: i32) -> (i32, i32, i32) {
    %c0_i32 = arith.constant 0 : i32
    %c0_i32_0 = arith.constant 0 : i32
    return %arg0, %c0_i32, %arg1 : i32, i32, i32
  }
}

</mosaic_0001>

<bundles_post_ra>
// kernel: tile.8
= control target key start
LH: loop header
LB: loop body
LE: loop exit
PB: predicated region body
PF: predicated region fallthrough
CT: control target
= control target key end

     0   :  { %s22_s0 = inlined_call_operand.vmem [shape: f32[8], index: 0, kind: input, shape index: {}]   ;;  %s23_s1 = inlined_call_operand.vmem [shape: f32[2,8], index: 1, kind: output, shape index: {}]  }
   0x1   :  { %v4_v0 = vld [vmem:[%s22_s0] ss:$0 sm:$0xff] }
   0x2   :  { %5 = vst [vmem:[%s23_s1] sm:$0x3] %v4_v0 }

// kernel: tile.0
= control target key start
LH: loop header
LB: loop body
LE: loop exit
PB: predicated region body
PF: predicated region fallthrough
CT: control target
= control target key end

     0   :  { %s66_s8 = smov 125   ;;  %s67_s9 = smov 123   ;;  %vm7_vm0 = vcmask 7168   ;;  %s117_s0 = inlined_call_operand.vmem [shape: f32[2,8], index: 0, kind: input, shape index: {}]   ;;  %s118_s1 = inlined_call_operand.vmem [shape: f32[16,1], index: 1, kind: output, shape index: {}]  }
   0x1   :  { %v4_v0 = vld [vmem:[%s117_s0] sm:$0x3]  ;;  %s65_s0 = smov 127   ;;  %s68_s10 = smov 126  }
   0x2   :  { %5 = vst [vmem:[#allocation0] sm:$0x3] %v4_v0  ;;  %s69_s11 = smov 124   ;;  %s70_s12 = smov 122  }
   0x3   :  { %s71_s13 = smov 121  }
   0x9   :  { %v9_v1 = vld [vmem:[#allocation0] sm:$0x3]  }
   0xa   :  { %v21_v2 = vld [vmem:[#allocation0] sm:$0x3]   ;;  %10 = vrot.lane.b32.xlu0 %v9_v1, %s65_s0 }
   0xb   :  { %22 = vrot.lane.b32.xlu1 %v21_v2, %s66_s8  ;;  %v33_v3 = vld [vmem:[#allocation0] sm:$0x3]  }
   0xc   :  { %34 = vrot.lane.b32.xlu2 %v33_v3, %s67_s9  ;;  %v15_v4 = vld [vmem:[#allocation0] sm:$0x3]  }
   0xd   :  { %v27_v5 = vld [vmem:[#allocation0] sm:$0x3]  }
   0xe   :  { %v39_v6 = vld [vmem:[#allocation0] sm:$0x3]  }
   0xf   :  { %v45_v7 = vld [vmem:[#allocation0] sm:$0x3]  }
  0x10   :  { %v6_v8 = vld [vmem:[#allocation0] sm:$0x3]  }
  0x11   :  { %8 = vst.msk [vmem:[%s118_s1] ss:$8 sm:$0x3] %vm7_vm0, %v6_v8  }
  0x12   :  { %16 = vrot.lane.b32.xlu0 %v15_v4, %s68_s10 }
  0x13   :  { %28 = vrot.lane.b32.xlu1 %v27_v5, %s69_s11 }
  0x14   :  { %40 = vrot.lane.b32.xlu2 %v39_v6, %s70_s12 }
  0x1a   :  { %46 = vrot.lane.b32.xlu0 %v45_v7, %s71_s13 }
  0x66   :  { %v35_v9 = vpop.permute.xlu2 %34  }
  0x67   :  { %55 = vst.msk [vmem:[%s118_s1 + $0x5] ss:$8 sm:$0x3] %vm7_vm0, %v35_v9  }
  0x6e   :  { %v41_v10 = vpop.permute.xlu2 %40  }
  0x6f   :  { %56 = vst.msk [vmem:[%s118_s1 + $0x6] ss:$8 sm:$0x3] %vm7_vm0, %v41_v10  }
  0x7c   :  { %v11_v11 = vpop.permute.xlu0 %10  }
  0x7d   :  { %v23_v12 = vpop.permute.xlu1 %22   ;;  %51 = vst.msk [vmem:[%s118_s1 + $0x1] ss:$8 sm:$0x3] %vm7_vm0, %v11_v11  }
  0x7e   :  { %53 = vst.msk [vmem:[%s118_s1 + $0x3] ss:$8 sm:$0x3] %vm7_vm0, %v23_v12  }
  0x84   :  { %v17_v13 = vpop.permute.xlu0 %16  }
  0x85   :  { %v29_v14 = vpop.permute.xlu1 %28   ;;  %52 = vst.msk [vmem:[%s118_s1 + $0x2] ss:$8 sm:$0x3] %vm7_vm0, %v17_v13  }
  0x86   :  { %54 = vst.msk [vmem:[%s118_s1 + $0x4] ss:$8 sm:$0x3] %vm7_vm0, %v29_v14  }
  0x8c   :  { %v47_v15 = vpop.permute.xlu0 %46  }
  0x8d   :  { %57 = vst.msk [vmem:[%s118_s1 + $0x7] ss:$8 sm:$0x3] %vm7_vm0, %v47_v15  }

// kernel: decoder_block_forward.2
= control target key start
LH: loop header
LB: loop body
LE: loop exit
PB: predicated region body
PF: predicated region fallthrough
CT: control target
= control target key end

     0   :  { %s683_s18 = smov 0   ;;  %s685_s19 = smov 0   ;;  %s747_s0 = inlined_call_operand.vmem [shape: bf16[2,16,16], index: 0, kind: input, shape index: {}]   ;;  %s748_s1 = inlined_call_operand.vmem [shape: bf16[1,16,128], index: 1, kind: input, shape index: {}, may-alias: {1,2}]   ;;  %s749_s2 = inlined_call_operand.vmem [shape: bf16[1,16,128], index: 2, kind: input, shape index: {}, may-alias: {1,2}]   ;;  %s750_s3 = inlined_call_operand.vmem [shape: bf16[3,16,16], index: 3, kind: input, shape index: {}]   ;;  %s751_s4 = inlined_call_operand.vmem [shape: f32[16,1], index: 4, kind: input, shape index: {}]   ;;  %s752_s5 = inlined_call_operand.vmem [shape: bf16[2,16,16], index: 5, kind: output, shape index: {}]  }
   0x1   :  { %s687_s20 = smov 0  }
   0x2 LB: > { %s27_s21 = sadd.s32 1, %s641_s19  ;;  %p547_p0 = scmp.ge.s32.totalorder %s645_s20, 1  ;;  %s645_s20 = sphi %s687_s20, %s15_s20   ;;  %s641_s19 = sphi %s685_s19, %s754_s19   ;;  %s637_s18 = sphi %s683_s18, %s753_s18  }
   0x3   : > { %p29_p1 = scmp.ge.s32.totalorder %s27_s21, 2  ;;  %p206_p2 = scmp.lt.s32.totalorder %s645_s20, 3 }
   0x5   : > { %s756_s21 = smov (%p29_p1, %s27_s21), 0  ;;  %p207_p3 = pnand %p547_p0, %p206_p2 }
   0x6   : > { %p240_p4 = scmp.lt.s32.totalorder (!%p207_p3), %s637_s18, 1  ;;  %s648_s27 = smov (!%p207_p3), 1  }
   0x7   : > { %210 = sbr.rel (%p207_p3) target bundleno = 424 (0x1a8), region = 40  ;;  %s649_s6 = smov (!%p207_p3), 17  }
   0x8   : > { %s650_s7 = smov (!%p207_p3), 127   ;;  %s651_s8 = smov (!%p207_p3), 126  }
   0xc   : > { %v584_v0 = vld [vmem:[%s748_s1] sm:$0xff]   ;;  %v647_v4 = vmov 0.0   ;;  %s758_s18 = smov (!%p240_p4, %s637_s18), 1  ;;  %vm333_vm0 = vcmask 7168   ;;  %vm337_vm1 = vcmask 138240   ;;  %vm371_vm5 = vcmask 130048  }
   0xd   : > { %v588_v1 = vld [vmem:[%s749_s2] sm:$0xff]   ;;  %v585_v2 = vunpack.c.l.bf16 %v584_v0  ;;  %v586_v3 = vunpack.c.h.bf16 %v584_v0  ;;  %v292_v5 = vunpack.c.l.bf16 %v647_v4  ;;  %s577_s26 = sshll.u32 %s758_s18, 3  ;;  %v442_v39 = vld [vmem:[%s751_s4 + $0x8] sm:$0xff]  ;;  %v652_v41 = vmov 0   ;;  %v582_v45 = vld [vmem:[%s750_s3 + $0x10] sm:$0xff] }
   0xe   : > { %v589_v6 = vunpack.c.l.bf16 %v588_v1  ;;  %v590_v7 = vunpack.c.h.bf16 %v588_v1  ;;  %s247_s30 = scalar_lea.vmem %s747_s0, %s577_s26  ;;  %v580_v38 = vld [vmem:[%s750_s3] sm:$0xff]  ;;  %622 = vset.pattern.permute.xlu0 %v652_v41  ;;  %621 = vset.pattern.permute.xlu2 %v652_v41  ;;  %v581_v43 = vld [vmem:[%s750_s3 + $0x8] sm:$0xff]  ;;  %s255_s25 = scalar_lea.vmem %s752_s5, %s577_s26  ;;  %vm457_vm6 = vcmask 125952  }
   0xf   : > { %v293_v8 = vmul.f32 %v585_v2, %v292_v5  ;;  %v294_v9 = vmul.f32 %v586_v3, %v292_v5  ;;  %v579_v22 = vld [vmem:[%s247_s30] sm:$0xff] }
  0x10   : > { %v306_v10 = vmul.f32 %v589_v6, %v292_v5  ;;  %v307_v11 = vmul.f32 %v590_v7, %v292_v5  ;;  %v441_v40 = vld [vmem:[%s751_s4] sm:$0xff] }
  0x11   : > { %v295_v12 = vpack.c.bf16 %v293_v8, %v293_v8  ;;  %v296_v13 = vpack.c.bf16 %v294_v9, %v294_v9 }
  0x12   : > { %v308_v14 = vpack.c.bf16 %v306_v10, %v306_v10  ;;  %v309_v15 = vpack.c.bf16 %v307_v11, %v307_v11 }
  0x13   : > { %v314_v16 = vunpack.c.l.b16 %v295_v12  ;;  %v315_v17 = vunpack.c.l.b16 %v296_v13 }
  0x14   : > { %v328_v18 = vunpack.c.l.b16 %v308_v14  ;;  %v329_v19 = vunpack.c.l.b16 %v309_v15 }
  0x15   : > { %v316_v20 = vpack.c.b16 %v315_v17, %v314_v16 }
  0x16   : > { %v330_v21 = vpack.c.b16 %v329_v19, %v328_v18 }
  0x17   : > { %317 = vrot.lane.b32.xlu0 %v316_v20, %s648_s27 }
  0x18   : > { %331 = vrot.lane.b32.xlu1 %v330_v21, %s649_s6 }
  0x1f   : > { %324 = vrot.lane.b32.xlu0 %v579_v22, %s648_s27 }
  0x27   : > { %450 = vperm.xlu0 %622, %v442_v39  }
  0x89   : > { %v318_v23 = vpop.permute.xlu0 %317 }
  0x8a   : > { %v332_v24 = vpop.permute.xlu1 %331 }
  0x91   : > { %v325_v25 = vpop.permute.xlu0 %324 }
  0x92   : > { %v336_v26 = vsel %vm333_vm0, %v318_v23, %v325_v25 }
  0x93   : > { %v339_v27 = vsel %vm337_vm1, %v336_v26, %v332_v24 }
  0x94   : > { %v341_v28 = vunpack.c.l.bf16 %v339_v27  ;;  %v342_v29 = vunpack.c.h.bf16 %v339_v27 }
  0x96   : > { %v345_v30 = vmul.f32 0.010009766, %v341_v28  ;;  %v346_v31 = vmul.f32 0.010009766, %v342_v29  ;;  %vm343_vm2 = vcmp.ge.f32.partialorder %v341_v28, 0.0  ;;  %vm344_vm3 = vcmp.ge.f32.partialorder %v342_v29, 0.0 }
  0x97   : > { %vm349_vm4 = vmpackc.low %vm344_vm3, %vm343_vm2 }
  0x98   : > { %v347_v32 = vpack.c.bf16 %v345_v30, %v345_v30  ;;  %v348_v33 = vpack.c.bf16 %v346_v31, %v346_v31 }
  0x99   : > { %v451_v58 = vpop.permute.xlu0 %450 }
  0x9a   : > { %v352_v34 = vunpack.c.l.b16 %v347_v32  ;;  %v353_v35 = vunpack.c.l.b16 %v348_v33 }
  0x9c   : > { %v354_v36 = vpack.c.b16 %v353_v35, %v352_v34 }
  0x9e   : > { %v356_v37 = vsel %vm349_vm4, %v339_v27, %v354_v36 }
  0x9f   : > { %368 = vrot.lane.b32.xlu2 %v356_v37, %s650_s7  ;;  %419 = vrot.lane.b32.xlu1 %v356_v37, %s651_s8 }
  0xa0   : > { %404 = vmatpush.bf16.msra.mxu1 %v356_v37 }
  0xa3   : > { %567 = vmatmul.msk.bf16.vlgmr.msra.gmra.mxu1 %vm371_vm5, %v580_v38 }
  0xa7   : > { %445 = vperm.xlu2 %621, %v441_v40  }
  0xf9   : > { %v369_v42 = vpop.permute.xlu2 %368 }
  0xfa   : > { %382 = vmatpush.bf16.msra.mxu0 %v369_v42 }
  0xfd   : > { %562 = vmatmul.msk.bf16.vlgmr.msra.gmra.mxu0 %vm371_vm5, %v581_v43 }
 0x101   : > { %v446_v50 = vpop.permute.xlu2 %445 }
 0x111   : > { %v420_v44 = vpop.permute.xlu1 %419 }
 0x112   : > { %432 = vmatpush.bf16.msra.mxu2 %v420_v44 }
 0x115   : > { %574 = vmatmul.msk.bf16.vlgmr.msra.gmra.mxu2 %vm371_vm5, %v582_v45 }
 0x120   : > { %v406_v47 = vpop.f32.mrf.mxu1 }
 0x128   : > { %v408_v54 = vpop.f32.mrf.mxu1 }
 0x17a   : > { %v384_v46 = vpop.f32.mrf.mxu0 }
 0x17b   : > { %v407_v48 = vadd.f32 %v406_v47, %v384_v46 }
 0x182   : > { %v386_v53 = vpop.f32.mrf.mxu0 }
 0x183   : > { %v409_v56 = vadd.f32 %v408_v54, %v386_v53 }
 0x198   : > { %v434_v49 = vpop.f32.mrf.mxu2 }
 0x199   : > { %v439_v51 = vadd.f32 %v434_v49, %v407_v48 }
 0x19b   : > { %v453_v52 = vadd.f32 %v446_v50, %v439_v51 }
 0x19d   : > { %v455_v55 = vpack.c.bf16 %v453_v52, %v453_v52 }
 0x19f   : > { %458 = vst.msk [vmem:[%s255_s25] sm:$0xf] %vm457_vm6, %v455_v55 }
 0x1a0   : > { %v436_v57 = vpop.f32.mrf.mxu2 }
 0x1a1   : > { %v440_v59 = vadd.f32 %v436_v57, %v409_v56 }
 0x1a3   : > { %v454_v60 = vadd.f32 %v451_v58, %v440_v59 }
 0x1a5   : > { %v456_v61 = vpack.c.bf16 %v454_v60, %v454_v60 }
 0x1a7   : > { %459 = vst.msk [vmem:[%s255_s25 + $0x4] sm:$0xf] %vm457_vm6, %v456_v61 }
 0x1a8 PF: > { %s15_s20 = sadd.s32 1, %s645_s20   ;;  %s753_s18 = smov %s641_s19 }
 0x1a9   : > { %p12_p5 = scmp.ge.s32.totalorder %s15_s20, 4   ;;  %s754_s19 = smov %s756_s21 }
 0x1ab   :  { %14 = sbr.rel (!%p12_p5) target bundleno = 2 (0x2), region = 72 }

// kernel: decoder_block_forward.3
= control target key start
LH: loop header
LB: loop body
LE: loop exit
PB: predicated region body
PF: predicated region fallthrough
CT: control target
= control target key end

     0   :  { %12 = vsyncpa [#allocation3], 0  ;;  %s1390_s0 = inlined_call_operand.vmem [shape: bf16[2,8,32], index: 0, kind: input, shape index: {}]   ;;  %s1391_s1 = inlined_call_operand.vmem [shape: bf16[1,8,128], index: 1, kind: input, shape index: {}, may-alias: {1,2}]   ;;  %s1392_s2 = inlined_call_operand.vmem [shape: bf16[1,8,128], index: 2, kind: input, shape index: {}, may-alias: {1,2}]   ;;  %s1393_s3 = inlined_call_operand.vmem [shape: bf16[2,7,8,8], index: 3, kind: input, shape index: {}]   ;;  %s1394_s4 = inlined_call_operand.vmem [shape: f32[2,8,1], index: 4, kind: input, shape index: {}]   ;;  %s1395_s5 = inlined_call_operand.vmem [shape: bf16[2,8,8], index: 5, kind: input, shape index: {}]   ;;  %s1396_s6 = inlined_call_operand.vmem [shape: f32[2,8,1], index: 6, kind: input, shape index: {}]   ;;  %s1397_s7 = inlined_call_operand.hbm [shape: bf16[2,8,32], index: 7, kind: output, shape index: {}]  }
   0x1   :  { %14 = vsyncpa [#allocation3 + $0x1], 0  ;;  %s1172_s24 = smov 0   ;;  %s1174_s25 = smov 0  }
   0x2   :  { %s1176_s26 = smov 0   ;;  %s1178_s27 = smov 0  }
   0x3   :  { %s1180_s28 = smov 0   ;;  %s1182_s29 = smov 0  }
   0x4 LB: > { %s919_s30 = sadd.s32 4294967295, %s1114_s29   ;;  %s920_s8 = sadd.s32 4294967294, %s1114_s29   ;;  %s1114_s29 = sphi %s1182_s29, %s20_s29   ;;  %s1110_s28 = sphi %s1180_s28, %s1404_s28   ;;  %s1106_s27 = sphi %s1178_s27, %s1403_s27   ;;  %s1102_s26 = sphi %s1176_s26, %s1402_s26   ;;  %s1098_s25 = sphi %s1174_s25, %s1401_s25   ;;  %s1094_s24 = sphi %s1172_s24, %s1400_s24  }
   0x5   : > { %s32_s9 = sadd.s32 1, %s1110_s28  ;;  %s195_s10 = sadd.s32 1, %s1102_s26 }
   0x6   : > { %p34_p0 = scmp.ge.s32.totalorder %s32_s9, 2  ;;  %p205_p1 = scmp.ne.s32.totalorder %s1102_s26, %s1098_s25 }
   0x7   : > { %p206_p2 = scmp.eq.s32.totalorder %s919_s30, 1  ;;  %p211_p3 = scmp.ne.s32.totalorder %s1098_s25, %s1094_s24 }
   0x8   : > { %s1406_s9 = smov (%p34_p0, %s32_s9), 0  ;;  %p212_p5 = scmp.eq.s32.totalorder %s920_s8, 1 }
   0x9   : > { %p1212_p4 = por %p206_p2, %p205_p1  ;;  %s190_s12 = ssub.s32 %s1110_s28, %s1406_s9 }
   0xa   : > { %p923_p6 = scmp.ge.s32.totalorder %s1114_s29, 1  ;;  %p193_p7 = scmp.eq.s32.totalorder %s190_s12, 0 }
   0xb   : > { %p1219_p8 = por %p212_p5, %p211_p3  ;;  %p258_p9 = scmp.lt.s32.totalorder %s1114_s29, 3 }
   0xc   : > { %s1225_s14 = scalar_select %p193_p7, %s1102_s26, %s195_s10  }
   0xd   : > { %p259_p10 = pnand %p923_p6, %p258_p9 }
   0xe   : > { %p292_p11 = scmp.lt.s32.totalorder (!%p259_p10), %s1106_s27, 1  ;;  %s1117_s30 = smov (!%p259_p10), 12  }
   0xf   : > { %262 = sbr.rel (%p259_p10) target bundleno = 1426 (0x592), region = 48  ;;  %s1118_s8 = smov (!%p259_p10), 44  }
  0x10   : > { %s1119_s10 = smov (!%p259_p10), 122   ;;  %s1120_s12 = smov (!%p259_p10), 127  }
  0x11   : > { %s1121_s15 = smov (!%p259_p10), 126   ;;  %s1122_s16 = smov (!%p259_p10), 125  }
  0x12   : > { %s1123_s17 = smov (!%p259_p10), 124   ;;  %s1124_s18 = smov (!%p259_p10), 123  }
  0x13   : > { %s1130_s21 = smov (!%p259_p10), 110  }
  0x14   : > { %v327_v0 = vld [vmem:[%s1391_s1] sm:$0xf]  ;;  %v1116_v2 = vmov 0.0   ;;  %s293_s19 = scalar_select %p292_p11, %s1106_s27, 1  ;;  %vm361_vm0 = vcmask 97280   ;;  %vm365_vm1 = vcmask 359424  }
  0x15   : > { %v332_v1 = vunpack.c.l.bf16 %v327_v0  ;;  %v333_v3 = vunpack.c.l.bf16 %v1116_v2  ;;  %v336_v4 = vld [vmem:[%s1392_s2] sm:$0xf]  ;;  %vm386_vm3 = vcmask 1043456   ;;  %vm382_vm4 = vcmask 64512   ;;  %v926_v32 = vld [vmem:[%s1393_s3 + $0x4] sm:$0xf] }
  0x16   : > { %v341_v5 = vunpack.c.l.bf16 %v336_v4  ;;  %s925_s20 = sshll.u32 %s293_s19, 2  ;;  %v374_v29 = vld [vmem:[%s1393_s3] sm:$0xf]  ;;  %v931_v35 = vld [vmem:[%s1393_s3 + $0xc] sm:$0xf]  ;;  %v1125_v37 = vmov 0  }
  0x17   : > { %v334_v6 = vmul.f32 %v333_v3, %v332_v1  ;;  %s298_s23 = scalar_lea.vmem %s1390_s0, %s925_s20  ;;  %v542_v36 = vld [vmem:[%s1394_s4] sm:$0xff]  ;;  %1033 = vset.pattern.permute.xlu0 %v1125_v37  ;;  %1034 = vset.pattern.permute.xlu1 %v1125_v37  ;;  %v935_v40 = vld [vmem:[%s1393_s3 + $0x14] sm:$0xf]  ;;  %v929_v45 = vld [vmem:[%s1393_s3 + $0x8] sm:$0xf]  ;;  %s1128_s19 = smov 113  }
  0x18   : > { %v343_v7 = vmul.f32 %v341_v5, %v333_v3  ;;  %v345_v11 = vld [vmem:[%s298_s23] sm:$0xf]  ;;  %1035 = vset.pattern.permute.xlu2 %v1125_v37  ;;  %v933_v48 = vld [vmem:[%s1393_s3 + $0x10] sm:$0xf]  ;;  %v937_v49 = vld [vmem:[%s1393_s3 + $0x18] sm:$0xf] }
  0x19   : > { %v335_v8 = vpack.c.bf16 %v334_v6, %v334_v6  ;;  %v352_v15 = vunpack.c.l.b16 %v345_v11  ;;  %v554_v58 = vld [vmem:[%s1396_s6] sm:$0xff]  ;;  %s1129_s20 = smov 116   ;;  %vm829_vm12 = vcmask 257024  }
  0x1a   : > { %v344_v9 = vpack.c.bf16 %v343_v7, %v343_v7 }
  0x1b   : > { %v347_v10 = vunpack.c.l.b16 %v335_v8  ;;  %v353_v16 = vpack.c.b16 %v352_v15, %v352_v15 }
  0x1c   : > { %v357_v12 = vunpack.c.l.b16 %v344_v9 }
  0x1d   : > { %v348_v13 = vpack.c.b16 %v347_v10, %v347_v10 }
  0x1e   : > { %v358_v14 = vpack.c.b16 %v357_v12, %v357_v12 }
  0x1f   : > { %349 = vrot.lane.b32.xlu0 %v348_v13, %s1117_s30  ;;  %v553_v13 = vld [vmem:[%s1395_s5] sm:$0xf] }
  0x20   : > { %359 = vrot.lane.b32.xlu1 %v358_v14, %s1118_s8 }
  0x27   : > { %354 = vrot.lane.b32.xlu0 %v353_v16, %s1117_s30 }
  0x91   : > { %v350_v17 = vpop.permute.xlu0 %349 }
  0x92   : > { %v360_v18 = vpop.permute.xlu1 %359 }
  0x99   : > { %v355_v19 = vpop.permute.xlu0 %354 }
  0x9a   : > { %v364_v20 = vsel %vm361_vm0, %v350_v17, %v355_v19 }
  0x9b   : > { %v367_v21 = vsel %vm365_vm1, %v364_v20, %v360_v18  ;;  %v584_v20 = vlaneseq }
  0x9c   : > { %v1238_v22 = vunpack.c.l.bf16 %v367_v21 }
  0x9d   : > { %v1293_v21 = vand.u32 127, %v584_v20 }
  0x9e   : > { %vm370_vm2 = vcmp.ge.f32.partialorder %v1238_v22, 0.0  ;;  %v371_v23 = vmul.f32 0.01, %v1238_v22 }
  0x9f   : > { %vm819_vm11 = vcmp.lt.s32.totalorder %v1293_v21, 32 }
  0xa0   : > { %v372_v24 = vsel %vm370_vm2, %v1238_v22, %v371_v23  ;;  %v589_v23 = vadd.s32 4294967287, %v1293_v21 }
  0xa1   : > { %v373_v25 = vpack.c.bf16 %v372_v24, %v372_v24 }
  0xa2   : > { %vm590_vm6 = vcmp.ge.s32.totalorder %v589_v23, 0  ;;  %vm591_vm7 = vcmp.lt.s32.totalorder %v589_v23, 32 }
  0xa3   : > { %v378_v26 = vunpack.c.l.b16 %v373_v25  ;;  %v407_v27 = vsel %vm386_vm3, %v373_v25, 0  ;;  %vm592_vm8 = vmand %vm590_vm6, %vm591_vm7 }
  0xa4   : > { %416 = vmatpush.bf16.msra.mxu1 %v407_v27 }
  0xa5   : > { %v379_v28 = vpack.c.b16 %v378_v26, %v378_v26 }
  0xa7   : > { %520 = vrot.lane.b32.xlu0 %v379_v28, %s1119_s10  ;;  %380 = vrot.lane.b32.xlu2 %v379_v28, %s1120_s12 }
  0xa8   : > { %424 = vrot.lane.b32.xlu1 %v379_v28, %s1121_s15  ;;  %928 = vmatmul.msk.bf16.vlgmr.msra.gmra.mxu1 %vm382_vm4, %v374_v29 }
  0xaf   : > { %448 = vrot.lane.b32.xlu2 %v379_v28, %s1122_s16  ;;  %545 = vperm.xlu0 %1033, %v542_v36  }
  0xb0   : > { %472 = vrot.lane.b32.xlu1 %v379_v28, %s1123_s17  ;;  %s1126_s17 = smov 3  }
  0xb7   : > { %496 = vrot.lane.b32.xlu2 %v379_v28, %s1124_s18  ;;  %s1127_s18 = smov 119  }
  0xb8   : > { %557 = vperm.xlu1 %1034, %v554_v58  }
 0x101   : > { %v381_v30 = vpop.permute.xlu2 %380 }
 0x102   : > { %v388_v31 = vsel %vm386_vm3, %v381_v30, 0 }
 0x103   : > { %397 = vmatpush.bf16.msra.mxu0 %v388_v31  ;;  %v956_v31 = vld [vmem:[%s1396_s6 + $0x8] sm:$0xff] }
 0x106   : > { %927 = vmatmul.msk.bf16.vlgmr.msra.gmra.mxu0 %vm382_vm4, %v926_v32  ;;  %v940_v32 = vld [vmem:[%s1393_s3 + $0x1c] sm:$0xf] }
 0x109   : > { %v449_v33 = vpop.permute.xlu2 %448 }
 0x10a   : > { %v454_v34 = vsel %vm386_vm3, %v449_v33, 0 }
 0x10b   : > { %463 = vmatpush.bf16.msra.mxu3 %v454_v34 }
 0x10e   : > { %932 = vmatmul.msk.bf16.vlgmr.msra.gmra.mxu3 %vm382_vm4, %v931_v35  ;;  %v944_v35 = vld [vmem:[%s1393_s3 + $0x24] sm:$0xf] }
 0x111   : > { %v497_v38 = vpop.permute.xlu2 %496 }
 0x112   : > { %v502_v39 = vsel %vm386_vm3, %v497_v38, 0  ;;  %v954_v38 = vld [vmem:[%s1394_s4 + $0x8] sm:$0xff] }
 0x113   : > { %511 = vmatpush.bf16.msrb.mxu1 %v502_v39  ;;  %v952_v39 = vld [vmem:[%s1393_s3 + $0x34] sm:$0xf] }
 0x116   : > { %936 = vmatmul.msk.bf16.vlgmr.msrb.gmra.mxu1 %vm382_vm4, %v935_v40 }
 0x119   : > { %v521_v41 = vpop.permute.xlu0 %520 }
 0x11a   : > { %v425_v42 = vpop.permute.xlu1 %424  ;;  %v526_v43 = vsel %vm386_vm3, %v521_v41, 0 }
 0x11b   : > { %v430_v44 = vsel %vm386_vm3, %v425_v42, 0 }
 0x11c   : > { %439 = vmatpush.bf16.msra.mxu2 %v430_v44  ;;  %v941_v44 = vld [vmem:[%s1393_s3 + $0x20] sm:$0xf] }
 0x11f   : > { %930 = vmatmul.msk.bf16.vlgmr.msra.gmra.mxu2 %vm382_vm4, %v929_v45  ;;  %v946_v45 = vld [vmem:[%s1393_s3 + $0x28] sm:$0xf] }
 0x120   : > { %535 = vmatpush.bf16.msrb.mxu2 %v526_v43 }
 0x121   : > { %v546_v5 = vpop.permute.xlu0 %545 }
 0x122   : > { %v473_v46 = vpop.permute.xlu1 %472 }
 0x123   : > { %v478_v47 = vsel %vm386_vm3, %v473_v46, 0 }
 0x124   : > { %487 = vmatpush.bf16.msrb.mxu0 %v478_v47 }
 0x125   : > { %v418_v50 = vpop.f32.mrf.mxu1 }
 0x127   : > { %934 = vmatmul.msk.bf16.vlgmr.msrb.gmra.mxu0 %vm382_vm4, %v933_v48 }
 0x12a   : > { %v558_v14 = vpop.permute.xlu1 %557 }
 0x12d   : > { %v420_v51 = vpop.f32.mrf.mxu1 }
 0x12e   : > { %v948_v51 = vld [vmem:[%s1393_s3 + $0x2c] sm:$0xf] }
 0x12f   : > { %938 = vmatmul.msk.bf16.vlgmr.msrb.gmra.mxu2 %vm382_vm4, %v937_v49 }
 0x183   : > { %v399_v52 = vpop.f32.mrf.mxu0 }
 0x184   : > { %v419_v60 = vadd.f32 %v418_v50, %v399_v52  ;;  %v950_v50 = vld [vmem:[%s1393_s3 + $0x30] sm:$0xf] }
 0x18b   : > { %v401_v53 = vpop.f32.mrf.mxu0 }
 0x191   : > { %v465_v54 = vpop.f32.mrf.mxu3 }
 0x193   : > { %v513_v55 = vpop.f32.mrf.mxu1 }
 0x199   : > { %v467_v56 = vpop.f32.mrf.mxu3 }
 0x19b   : > { %v515_v57 = vpop.f32.mrf.mxu1 }
 0x1a2   : > { %v441_v59 = vpop.f32.mrf.mxu2 }
 0x1a3   : > { %v445_v62 = vadd.f32 %v441_v59, %v419_v60 }
 0x1a4   : > { %v489_v61 = vpop.f32.mrf.mxu0 }
 0x1a5   : > { %v469_v63 = vadd.f32 %v465_v54, %v445_v62 }
 0x1a7   : > { %v493_v2 = vadd.f32 %v489_v61, %v469_v63 }
 0x1a9   : > { %v517_v3 = vadd.f32 %v513_v55, %v493_v2 }
 0x1aa   : > { %v443_v0 = vpop.f32.mrf.mxu2 }
 0x1ac   : > { %v491_v1 = vpop.f32.mrf.mxu0 }
 0x1b2   : > { %v537_v4 = vpop.f32.mrf.mxu2 }
 0x1b3   : > { %v541_v6 = vadd.f32 %v537_v4, %v517_v3 }
 0x1b5   : > { %v548_v7 = vadd.f32 %v546_v5, %v541_v6 }
 0x1b7   : > { %v550_v8 = vmul.f32 0.01, %v548_v7  ;;  %vm549_vm5 = vcmp.ge.f32.partialorder %v548_v7, 0.0 }
 0x1b9   : > { %v551_v9 = vsel %vm549_vm5, %v548_v7, %v550_v8 }
 0x1ba   : > { %v539_v10 = vpop.f32.mrf.mxu2  ;;  %v552_v11 = vpack.c.bf16 %v551_v9, %v551_v9 }
 0x1bc   : > { %v564_v12 = vsel %vm386_vm3, %v552_v11, 0 }
 0x1bd   : > { %573 = vmatpush.bf16.msrb.mxu3 %v564_v12 }
 0x1c0   : > { %939 = vmatmul.msk.bf16.vlgmr.msrb.gmra.mxu3 %vm382_vm4, %v553_v13 }
 0x243   : > { %v575_v15 = vpop.f32.mrf.mxu3 }
 0x244   : > { %v576_v16 = vadd.f32 %v575_v15, %v558_v14  ;;  %v955_v14 = vld [vmem:[%s1395_s5 + $0x4] sm:$0xf] }
 0x246   : > { %580 = vrot.lane.b32.xlu2 %v576_v16, %s1126_s17  ;;  %s1131_s17 = smov 9  }
 0x24b   : > { %v577_v17 = vpop.f32.mrf.mxu3 }
 0x2a0   : > { %v581_v18 = vpop.permute.xlu2 %580 }
 0x2a1   : > { %v583_v19 = vadd.f32 %v581_v18, %v1238_v22 }
 0x2a3   : > { %596 = vrot.lane.b32.xlu1 %v583_v19, %s1122_s16 }
 0x315   : > { %v597_v24 = vpop.permute.xlu1 %596 }
 0x316   : > { %v1296_v25 = vsel %vm592_vm8, %v597_v24, 0.0 }
 0x317   : > { %vm600_vm9 = vcmp.ge.f32.partialorder %v1296_v25, 0.0  ;;  %v601_v26 = vmul.f32 0.01, %v1296_v25 }
 0x319   : > { %v602_v27 = vsel %vm600_vm9, %v1296_v25, %v601_v26 }
 0x31a   : > { %v603_v22 = vpack.c.bf16 %v602_v27, %v602_v27 }
 0x31c   : > { %v609_v28 = vunpack.c.l.b16 %v603_v22  ;;  %v636_v29 = vsel %vm386_vm3, %v603_v22, 0 }
 0x31d   : > { %645 = vmatpush.bf16.msra.mxu1 %v636_v29 }
 0x31e   : > { %v610_v30 = vpack.c.b16 %v609_v28, %v609_v28 }
 0x320   : > { %677 = vrot.lane.b32.xlu1 %v610_v30, %s1127_s18  ;;  %611 = vrot.lane.b32.xlu0 %v610_v30, %s1122_s16 }
 0x321   : > { %653 = vrot.lane.b32.xlu2 %v610_v30, %s1119_s10  ;;  %943 = vmatmul.msk.bf16.vlgmr.msra.gmra.mxu1 %vm382_vm4, %v940_v32 }
 0x328   : > { %725 = vrot.lane.b32.xlu1 %v610_v30, %s1128_s19  ;;  %701 = vrot.lane.b32.xlu0 %v610_v30, %s1129_s20  ;;  %s289_s19 = sand.u32 1, %s1098_s25  }
 0x329   : > { %749 = vrot.lane.b32.xlu2 %v610_v30, %s1130_s21  ;;  %s924_s20 = sshll.u32 %s289_s19, 2  ;;  %s959_s21 = sshll.u32 %s1106_s27, 2 }
 0x32a   : > { %s843_s30 = scalar_lea.hbm %s1397_s7, %s959_s21  ;;  %s291_s8 = scalar_lea.vmem [#allocation2], %s924_s20 }
 0x32b   : > { %s845_s10 = sshll.u32 %s291_s8, 4  ;;  %s847_s16 = sshll.u32 %s843_s30, 4  ;;  %s846_s10 = int_to_ptr.vmem [resolvable:$true] %s845_s10  ;;  %s848_s16 = int_to_ptr.hbm [resolvable:$true] %s847_s16 }
 0x32c   : > { %s1050_s12 = sshra.s32 %s848_s16, 4  ;;  %s1056_s20 = scalar_lea.hbm %s1397_s7, 8  ;;  %s1051_s12 = int_to_ptr.hbm [resolvable:$true] %s1050_s12 }
 0x32d   : > { %s1052_s27 = scalar_lea.hbm %s1051_s12, 4  ;;  %p1057_p1 = scmp.lt.s32.totalorder %s1051_s12, %s1397_s7 }
 0x32e   : > { %p1053_p12 = scmp.ne.s32.totalorder %s1051_s12, %s1052_s27  ;;  %p1058_p2 = scmp.lt.s32.totalorder %s1056_s20, %s1052_s27 }
 0x330   : > { %789 = vperm.xlu0 %1033, %v956_v31   ;;  %p1054_p13 = pnand %p1053_p12, %p1212_p4  ;;  %p1059_p3 = por %p1058_p2, %p1057_p1 }
 0x331   : > { %775 = vperm.xlu2 %1035, %v954_v38  }
 0x332   : > { %p1055_p0 = pneg %p1054_p13 }
 0x334   : > { %p1060_p5 = pnand %p1059_p3, %p1055_p0 }
 0x37b   : > { %v654_v33 = vpop.permute.xlu2 %653 }
 0x37c   : > { %v659_v34 = vsel %vm386_vm3, %v654_v33, 0 }
 0x37d   : > { %668 = vmatpush.bf16.msra.mxu2 %v659_v34 }
 0x380   : > { %945 = vmatmul.msk.bf16.vlgmr.msra.gmra.mxu2 %vm382_vm4, %v944_v35 }
 0x383   : > { %v750_v36 = vpop.permute.xlu2 %749 }
 0x384   : > { %v755_v37 = vsel %vm386_vm3, %v750_v36, 0 }
 0x385   : > { %764 = vmatpush.bf16.msrb.mxu2 %v755_v37 }
 0x38b   : > { %v776_v6 = vpop.permute.xlu2 %775 }
 0x390   : > { %953 = vmatmul.msk.bf16.vlgmr.msrb.gmra.mxu2 %vm382_vm4, %v952_v39 }
 0x392   : > { %v678_v40 = vpop.permute.xlu1 %677  ;;  %v612_v41 = vpop.permute.xlu0 %611 }
 0x393   : > { %v683_v42 = vsel %vm386_vm3, %v678_v40, 0  ;;  %v617_v43 = vsel %vm386_vm3, %v612_v41, 0 }
 0x394   : > { %626 = vmatpush.bf16.msra.mxu0 %v617_v43  ;;  %692 = vmatpush.bf16.msra.mxu3 %v683_v42 }
 0x397   : > { %942 = vmatmul.msk.bf16.vlgmr.msra.gmra.mxu0 %vm382_vm4, %v941_v44  ;;  %947 = vmatmul.msk.bf16.vlgmr.msra.gmra.mxu3 %vm382_vm4, %v946_v45 }
 0x39a   : > { %v726_v46 = vpop.permute.xlu1 %725  ;;  %v702_v47 = vpop.permute.xlu0 %701 }
 0x39b   : > { %v731_v48 = vsel %vm386_vm3, %v726_v46, 0  ;;  %v707_v49 = vsel %vm386_vm3, %v702_v47, 0 }
 0x39c   : > { %716 = vmatpush.bf16.msrb.mxu0 %v707_v49  ;;  %740 = vmatpush.bf16.msrb.mxu1 %v731_v48 }
 0x39e   : > { %v647_v52 = vpop.f32.mrf.mxu1 }
 0x39f   : > { %951 = vmatmul.msk.bf16.vlgmr.msrb.gmra.mxu1 %vm382_vm4, %v950_v50 }
 0x3a2   : > { %v790_v15 = vpop.permute.xlu0 %789 }
 0x3a6   : > { %v649_v53 = vpop.f32.mrf.mxu1 }
 0x3a7   : > { %949 = vmatmul.msk.bf16.vlgmr.msrb.gmra.mxu0 %vm382_vm4, %v948_v51 }
 0x403   : > { %v670_v54 = vpop.f32.mrf.mxu2 }
 0x40b   : > { %v672_v55 = vpop.f32.mrf.mxu2 }
 0x413   : > { %v766_v56 = vpop.f32.mrf.mxu2 }
 0x414   : > { %v628_v57 = vpop.f32.mrf.mxu0 }
 0x415   : > { %v648_v62 = vadd.f32 %v647_v52, %v628_v57 }
 0x417   : > { %v674_v63 = vadd.f32 %v670_v54, %v648_v62 }
 0x41a   : > { %v694_v58 = vpop.f32.mrf.mxu3 }
 0x41b   : > { %v768_v59 = vpop.f32.mrf.mxu2  ;;  %v698_v1 = vadd.f32 %v694_v58, %v674_v63 }
 0x41c   : > { %v630_v60 = vpop.f32.mrf.mxu0  ;;  %v742_v61 = vpop.f32.mrf.mxu1 }
 0x422   : > { %v696_v0 = vpop.f32.mrf.mxu3 }
 0x424   : > { %v718_v2 = vpop.f32.mrf.mxu0  ;;  %v744_v3 = vpop.f32.mrf.mxu1 }
 0x425   : > { %v722_v4 = vadd.f32 %v718_v2, %v698_v1 }
 0x427   : > { %v746_v5 = vadd.f32 %v742_v61, %v722_v4 }
 0x429   : > { %v770_v7 = vadd.f32 %v766_v56, %v746_v5 }
 0x42b   : > { %v778_v8 = vadd.f32 %v776_v6, %v770_v7 }
 0x42c   : > { %v720_v9 = vpop.f32.mrf.mxu0 }
 0x42d   : > { %vm779_vm10 = vcmp.ge.f32.partialorder %v778_v8, 0.0  ;;  %v780_v10 = vmul.f32 0.01, %v778_v8 }
 0x42f   : > { %v781_v11 = vsel %vm779_vm10, %v778_v8, %v780_v10 }
 0x430   : > { %v782_v12 = vpack.c.bf16 %v781_v11, %v781_v11 }
 0x432   : > { %v796_v13 = vsel %vm386_vm3, %v782_v12, 0 }
 0x433   : > { %805 = vmatpush.bf16.msrb.mxu3 %v796_v13 }
 0x436   : > { %957 = vmatmul.msk.bf16.vlgmr.msrb.gmra.mxu3 %vm382_vm4, %v955_v14 }
 0x4b9   : > { %v807_v16 = vpop.f32.mrf.mxu3 }
 0x4ba   : > { %v808_v17 = vadd.f32 %v807_v16, %v790_v15 }
 0x4bc   : > { %812 = vrot.lane.b32.xlu1 %v808_v17, %s1131_s17 }
 0x4c1   : > { %v809_v18 = vpop.f32.mrf.mxu3 }
 0x52e   : > { %v813_v19 = vpop.permute.xlu1 %812 }
 0x52f   : > { %v815_v20 = vadd.f32 %v813_v19, %v1296_v25 }
 0x531   : > { %824 = vrot.lane.b32.xlu2 %v815_v20, %s1127_s18  ;;  %s832_s18 = scalar_lea.sflag [#allocation3], %s289_s19 }
 0x58b   : > { %v825_v23 = vpop.permute.xlu2 %824 }
 0x58c   : > { %v827_v24 = vsel %vm819_vm11, %v825_v23, 0.0 }
 0x58d   : > { %v828_v26 = vpack.c.bf16 %v827_v24, %v827_v24 }
 0x58f   : > { %830 = vst.msk [vmem:[%s291_s8] sm:$0xf] %vm829_vm12, %v828_v26 }
 0x590   : > { %1063 = shalt.err (!%p1060_p5)
}
 0x591   : > { %962 = dma.vmem_to_hbm [thread:$0]  (%p1212_p4), %s846_s10, 64, %s848_s16, %s832_s18  }
 0x592 PF: > { %p968_p6 = scmp.ge.s32.totalorder %s1114_s29, 2  ;;  %s859_s19 = sand.u32 1, %s1094_s24  }
 0x593   : > { %s860_s23 = scalar_lea.sflag [#allocation3], %s859_s19 }
 0x594   : > { %p965_p7 = pnand %p968_p6, %p1219_p8 }
 0x596   : > { %p966_p9 = pneg %p965_p7 }
 0x598   : > { %1089 = dma.done.wait (%p966_p9), %s860_s23, 64  }
 0x599   : > { %1091 = vsyncadd (%p966_p9), %s860_s23, 4294967232  ;;  %s20_s29 = sadd.s32 1, %s1114_s29   ;;  %s1400_s24 = smov %s1098_s25 }
 0x59a   : > { %p17_p10 = scmp.ge.s32.totalorder %s20_s29, 4   ;;  %s1401_s25 = smov %s1102_s26 }
 0x59b   : > { %s1402_s26 = smov %s1225_s14  ;;  %s1403_s27 = smov %s1110_s28 }
 0x59c   : > { %s1404_s28 = smov %s1406_s9  ;;  %19 = sbr.rel (!%p17_p10) target bundleno = 4 (0x4), region = 99 }
 0x5a1   :  { %866 = vsyncpa [#allocation3], 1 }
 0x5a2   :  { %868 = vsyncpa [#allocation3 + $0x1], 1 }

</bundles_post_ra>
